<compile_context>
chip_gen: v7x
topology: tpu7x:2x2x1
jax: 0.10.0
libtpu: 0.0.40
codegen_flags: <defaults>
</compile_context>

<pallas_src>
import jax
import jax.numpy as jnp
from jax.experimental import pallas as pl
from jax.experimental.pallas import tpu as pltpu


def _round_up(x, m):
    return ((x + m - 1) // m) * m


# ----------------------------------------------------------------------------
# Pallas kernels
# ----------------------------------------------------------------------------
def _conv_relu_pool_kernel(p_ref, w_ref, b_ref, o_ref):
    """Fused conv-as-GEMM + bias + ReLU + 2x2 maxpool epilogue.

    p_ref: (4, K, TM) bf16  im2col patches; axis 0 = 2x2 pool-window position
    w_ref: (Cout, K)  bf16  conv weight
    b_ref: (Cout, 1)  f32   conv bias
    o_ref: (Cout, TM) f32   pooled activations (pooled pixels on lanes)
    """
    w = w_ref[...]
    y = jnp.dot(w, p_ref[0], preferred_element_type=jnp.float32)
    y = jnp.maximum(y, jnp.dot(w, p_ref[1], preferred_element_type=jnp.float32))
    y = jnp.maximum(y, jnp.dot(w, p_ref[2], preferred_element_type=jnp.float32))
    y = jnp.maximum(y, jnp.dot(w, p_ref[3], preferred_element_type=jnp.float32))
    # relu/bias commute with the window max, so this equals pool(relu(conv + b)).
    o_ref[...] = jnp.maximum(y + b_ref[...], 0.0)


def _linear_kernel(x_ref, w_ref, b_ref, o_ref):
    o_ref[...] = (
        jnp.dot(x_ref[...], w_ref[...], preferred_element_type=jnp.float32)
        + b_ref[...]
    )


# ----------------------------------------------------------------------------
# im2col (pool-window grouped) -- pure layout plumbing, done by XLA in bf16
# ----------------------------------------------------------------------------
def _pool_grouped_patches(x_nchw, k, pad):
    """(N, C, H, W) -> (4, C*k*k, N*(H//2)*(W//2)) bf16 patches.

    Axis 0 enumerates the 2x2 pool-window position (dy*2 + dx); the K axis is
    ordered (ci, ky, kx) to match torch weight.reshape(Cout, -1); the M axis
    is ordered (n, ho, wo).
    """
    N, C, H, W = x_nchw.shape
    Ho, Wo = H // 2, W // 2
    kk = k * k
    xp = jnp.pad(x_nchw, ((0, 0), (0, 0), (pad, pad), (pad, pad)))
    xp = xp.astype(jnp.bfloat16)
    taps = [xp[:, :, ky:ky + H, kx:kx + W] for ky in range(k) for kx in range(k)]
    t = jnp.stack(taps, axis=2)                       # (N, C, kk, H, W)
    t = t.reshape(N, C, kk, Ho, 2, Wo, 2)
    t = t.transpose(4, 6, 1, 2, 0, 3, 5)              # (2, 2, C, kk, N, Ho, Wo)
    return t.reshape(4, C * kk, N * Ho * Wo)


# ----------------------------------------------------------------------------
# pallas_call wrappers
# ----------------------------------------------------------------------------
def conv_relu_pool(x_nchw, w, b, *, k, pad, tm=256):
    """PyTorch pool(relu(conv2d(x, w, b, padding=pad))) with 2x2/stride-2 pool."""
    N, C, H, W = x_nchw.shape
    Cout = w.shape[0]
    Ho, Wo = H // 2, W // 2
    K = C * k * k
    M = N * Ho * Wo

    patches = _pool_grouped_patches(x_nchw, k, pad)   # (4, K, M) bf16
    tm = min(tm, _round_up(M, 128))
    m_pad = _round_up(M, tm)
    patches = jnp.pad(patches, ((0, 0), (0, 0), (0, m_pad - M)))
    w2 = w.reshape(Cout, K).astype(jnp.bfloat16)
    b2 = b.reshape(Cout, 1).astype(jnp.float32)

    cost = pl.CostEstimate(
        flops=2 * 4 * Cout * K * m_pad,
        transcendentals=0,
        bytes_accessed=patches.size * 2 + w2.size * 2 + b2.size * 4
        + Cout * m_pad * 4,
    )
    out = pl.pallas_call(
        _conv_relu_pool_kernel,
        out_shape=jax.ShapeDtypeStruct((Cout, m_pad), jnp.float32),
        grid=(m_pad // tm,),
        in_specs=[
            pl.BlockSpec((4, K, tm), lambda i: (0, 0, i)),
            pl.BlockSpec((Cout, K), lambda i: (0, 0)),
            pl.BlockSpec((Cout, 1), lambda i: (0, 0)),
        ],
        out_specs=pl.BlockSpec((Cout, tm), lambda i: (0, i)),
        compiler_params=pltpu.CompilerParams(dimension_semantics=("parallel",)),
        cost_estimate=cost,
    )(patches, w2, b2)

    out = out[:, :M].reshape(Cout, N, Ho, Wo)         # drop lane padding
    return out.transpose(1, 0, 2, 3)                  # NCHW (N, Cout, Ho, Wo)


def linear(x, w, b, *, tile_rows=256):
    """PyTorch x @ w.T + b with w: (F, K)."""
    N, K = x.shape
    F = w.shape[0]
    tile_rows = min(tile_rows, _round_up(N, 8))
    n_pad = _round_up(N, tile_rows)
    xp = jnp.pad(x, ((0, n_pad - N), (0, 0))).astype(jnp.bfloat16)
    wt = w.T.astype(jnp.bfloat16)                     # (K, F)
    b2 = b.reshape(1, F).astype(jnp.float32)

    cost = pl.CostEstimate(
        flops=2 * n_pad * K * F,
        transcendentals=0,
        bytes_accessed=xp.size * 2 + wt.size * 2 + b2.size * 4 + n_pad * F * 4,
    )
    out = pl.pallas_call(
        _linear_kernel,
        out_shape=jax.ShapeDtypeStruct((n_pad, F), jnp.float32),
        grid=(n_pad // tile_rows,),
        in_specs=[
            pl.BlockSpec((tile_rows, K), lambda i: (i, 0)),
            pl.BlockSpec((K, F), lambda i: (0, 0)),
            pl.BlockSpec((1, F), lambda i: (0, 0)),
        ],
        out_specs=pl.BlockSpec((tile_rows, F), lambda i: (i, 0)),
        compiler_params=pltpu.CompilerParams(dimension_semantics=("parallel",)),
        cost_estimate=cost,
    )(xp, wt, b2)
    return out[:N]


# ----------------------------------------------------------------------------
# Forward pass, params, pure-JAX reference
# ----------------------------------------------------------------------------
def cnn_femnist_forward(x, p):
    x = x.reshape(-1, 1, 28, 28)
    h = conv_relu_pool(x, p["w1"], p["b1"], k=7, pad=3)   # (N, 32, 14, 14)
    h = conv_relu_pool(h, p["w2"], p["b2"], k=3, pad=1)   # (N, 64, 7, 7)
    flat = h.reshape(h.shape[0], -1)                      # NCHW flatten == torch flatten(1)
    return linear(flat, p["wo"], p["bo"])                 # (N, 62)


def init_params(key):
    ks = jax.random.split(key, 6)
    return {
        "w1": 0.1 * jax.random.normal(ks[0], (32, 1, 7, 7), jnp.float32),
        "b1": 0.1 * jax.random.normal(ks[1], (32,), jnp.float32),
        "w2": 0.05 * jax.random.normal(ks[2], (64, 32, 3, 3), jnp.float32),
        "b2": 0.1 * jax.random.normal(ks[3], (64,), jnp.float32),
        "wo": 0.02 * jax.random.normal(ks[4], (62, 64 * 7 * 7), jnp.float32),
        "bo": 0.1 * jax.random.normal(ks[5], (62,), jnp.float32),
    }


def reference_forward(x, p):
    """Pure-JAX f32 reference with PyTorch semantics (for tolerance check)."""
    x = x.reshape(-1, 1, 28, 28)

    def conv(h, w, b, pad):
        y = jax.lax.conv_general_dilated(
            h, w, window_strides=(1, 1), padding=[(pad, pad), (pad, pad)],
            dimension_numbers=("NCHW", "OIHW", "NCHW"),
            precision=jax.lax.Precision.HIGHEST)
        return y + b.reshape(1, -1, 1, 1)

    def pool(h):
        n, c, hh, ww = h.shape
        return h.reshape(n, c, hh // 2, 2, ww // 2, 2).max(axis=(3, 5))

    h = pool(jax.nn.relu(conv(x, p["w1"], p["b1"], 3)))
    h = pool(jax.nn.relu(conv(h, p["w2"], p["b2"], 1)))
    flat = h.reshape(h.shape[0], -1)
    return jnp.dot(flat, p["wo"].T, precision=jax.lax.Precision.HIGHEST) + p["bo"]


if __name__ == "__main__":
    key = jax.random.PRNGKey(0)
    k_x, k_p = jax.random.split(key)
    x = jax.random.normal(k_x, (2, 1, 28, 28), jnp.float32)   # batch=2 FEMNIST-size input
    params = init_params(k_p)

    out = jax.block_until_ready(jax.jit(cnn_femnist_forward)(x, params))
    assert out.shape == (2, 62) and out.dtype == jnp.float32

    ref = reference_forward(x, params)
    max_err = float(jnp.max(jnp.abs(out - ref)))
    assert max_err < 1e-1, f"mismatch vs f32 reference: max abs err {max_err}"
    print("KERNEL_OK")
</pallas_src>

<mosaic_0001>
module attributes {stable_mosaic.version = 11 : i64} {
  func.func @_conv_relu_pool_kernel(%arg0: i32, %arg1: memref<4x49x256xbf16, #tpu.memory_space<vmem>>, %arg2: memref<32x49xbf16, #tpu.memory_space<vmem>>, %arg3: memref<32x1xf32, #tpu.memory_space<vmem>>, %arg4: memref<32x256xf32, #tpu.memory_space<vmem>>) attributes {dimension_semantics = [#tpu.dimension_semantics<parallel>], iteration_bounds = array<i64: 2>, scalar_prefetch = 0 : i64, scratch_operands = 0 : i64, tpu.core_type = #tpu.core_type<tc>, window_params = [{transform_indices = @transform_0, window_bounds = array<i64: 4, 49, 256>}, {pipeline_mode = #tpu.pipeline_mode<synchronous>, transform_indices = @transform_1, window_bounds = array<i64: 32, 49>}, {pipeline_mode = #tpu.pipeline_mode<synchronous>, transform_indices = @transform_2, window_bounds = array<i64: 32, 1>}, {transform_indices = @transform_3, window_bounds = array<i64: 32, 256>}]} {
    %c0 = arith.constant 0 : index
    %c0_0 = arith.constant 0 : index
    %0 = vector.load %arg2[%c0, %c0_0] : memref<32x49xbf16, #tpu.memory_space<vmem>>, vector<32x49xbf16>
    %c0_1 = arith.constant 0 : index
    %c0_2 = arith.constant 0 : index
    %c0_3 = arith.constant 0 : index
    %1 = vector.load %arg1[%c0_1, %c0_2, %c0_3] : memref<4x49x256xbf16, #tpu.memory_space<vmem>>, vector<1x49x256xbf16>
    %2 = vector.shape_cast %1 : vector<1x49x256xbf16> to vector<49x256xbf16>
    %cst = arith.constant dense<0.000000e+00> : vector<32x256xf32>
    %3 = tpu.matmul %0, %2, %cst {dimension_numbers = #tpu.dot_dimension_numbers<[1], [0], [0], [1], [0, 0, 1, 1], [], []>} : vector<32x49xbf16>, vector<49x256xbf16>, vector<32x256xf32> -> vector<32x256xf32>
    %c1 = arith.constant 1 : index
    %c0_4 = arith.constant 0 : index
    %c0_5 = arith.constant 0 : index
    %4 = vector.load %arg1[%c1, %c0_4, %c0_5] : memref<4x49x256xbf16, #tpu.memory_space<vmem>>, vector<1x49x256xbf16>
    %5 = vector.shape_cast %4 : vector<1x49x256xbf16> to vector<49x256xbf16>
    %cst_6 = arith.constant dense<0.000000e+00> : vector<32x256xf32>
    %6 = tpu.matmul %0, %5, %cst_6 {dimension_numbers = #tpu.dot_dimension_numbers<[1], [0], [0], [1], [0, 0, 1, 1], [], []>} : vector<32x49xbf16>, vector<49x256xbf16>, vector<32x256xf32> -> vector<32x256xf32>
    %7 = arith.maximumf %3, %6 : vector<32x256xf32>
    %c2 = arith.constant 2 : index
    %c0_7 = arith.constant 0 : index
    %c0_8 = arith.constant 0 : index
    %8 = vector.load %arg1[%c2, %c0_7, %c0_8] : memref<4x49x256xbf16, #tpu.memory_space<vmem>>, vector<1x49x256xbf16>
    %9 = vector.shape_cast %8 : vector<1x49x256xbf16> to vector<49x256xbf16>
    %cst_9 = arith.constant dense<0.000000e+00> : vector<32x256xf32>
    %10 = tpu.matmul %0, %9, %cst_9 {dimension_numbers = #tpu.dot_dimension_numbers<[1], [0], [0], [1], [0, 0, 1, 1], [], []>} : vector<32x49xbf16>, vector<49x256xbf16>, vector<32x256xf32> -> vector<32x256xf32>
    %11 = arith.maximumf %7, %10 : vector<32x256xf32>
    %c3 = arith.constant 3 : index
    %c0_10 = arith.constant 0 : index
    %c0_11 = arith.constant 0 : index
    %12 = vector.load %arg1[%c3, %c0_10, %c0_11] : memref<4x49x256xbf16, #tpu.memory_space<vmem>>, vector<1x49x256xbf16>
    %13 = vector.shape_cast %12 : vector<1x49x256xbf16> to vector<49x256xbf16>
    %cst_12 = arith.constant dense<0.000000e+00> : vector<32x256xf32>
    %14 = tpu.matmul %0, %13, %cst_12 {dimension_numbers = #tpu.dot_dimension_numbers<[1], [0], [0], [1], [0, 0, 1, 1], [], []>} : vector<32x49xbf16>, vector<49x256xbf16>, vector<32x256xf32> -> vector<32x256xf32>
    %15 = arith.maximumf %11, %14 : vector<32x256xf32>
    %c0_13 = arith.constant 0 : index
    %c0_14 = arith.constant 0 : index
    %16 = vector.load %arg3[%c0_13, %c0_14] : memref<32x1xf32, #tpu.memory_space<vmem>>, vector<32x1xf32>
    %17 = vector.broadcast %16 : vector<32x1xf32> to vector<32x256xf32>
    %18 = arith.addf %15, %17 : vector<32x256xf32>
    %cst_15 = arith.constant 0.000000e+00 : f32
    %19 = vector.broadcast %cst_15 : f32 to vector<32x256xf32>
    %20 = arith.maximumf %18, %19 : vector<32x256xf32>
    %c0_16 = arith.constant 0 : index
    %c0_17 = arith.constant 0 : index
    %21 = vector.load %arg4[%c0_16, %c0_17] : memref<32x256xf32, #tpu.memory_space<vmem>>, vector<32x256xf32>
    tpu.vector_store %arg4[%c0_16, %c0_17], %20 {strides = array<i32>} : memref<32x256xf32, #tpu.memory_space<vmem>>, vector<32x256xf32>,
    return
  }
  func.func @transform_0(%arg0: i32) -> (i32, i32, i32) {
    %c0_i32 = arith.constant 0 : i32
    %c0_i32_0 = arith.constant 0 : i32
    %c0_i32_1 = arith.constant 0 : i32
    return %c0_i32, %c0_i32_0, %arg0 : i32, i32, i32
  }
  func.func @transform_1(%arg0: i32) -> (i32, i32) {
    %c0_i32 = arith.constant 0 : i32
    %c0_i32_0 = arith.constant 0 : i32
    %c0_i32_1 = arith.constant 0 : i32
    return %c0_i32, %c0_i32_0 : i32, i32
  }
  func.func @transform_2(%arg0: i32) -> (i32, i32) {
    %c0_i32 = arith.constant 0 : i32
    %c0_i32_0 = arith.constant 0 : i32
    %c0_i32_1 = arith.constant 0 : i32
    return %c0_i32, %c0_i32_0 : i32, i32
  }
  func.func @transform_3(%arg0: i32) -> (i32, i32) {
    %c0_i32 = arith.constant 0 : i32
    %c0_i32_0 = arith.constant 0 : i32
    return %c0_i32, %arg0 : i32, i32
  }
}

module attributes {stable_mosaic.version = 11 : i64} {
  func.func @_conv_relu_pool_kernel(%arg0: i32, %arg1: memref<4x288x128xbf16, #tpu.memory_space<vmem>>, %arg2: memref<64x288xbf16, #tpu.memory_space<vmem>>, %arg3: memref<64x1xf32, #tpu.memory_space<vmem>>, %arg4: memref<64x128xf32, #tpu.memory_space<vmem>>) attributes {dimension_semantics = [#tpu.dimension_semantics<parallel>], iteration_bounds = array<i64: 1>, scalar_prefetch = 0 : i64, scratch_operands = 0 : i64, tpu.core_type = #tpu.core_type<tc>, window_params = [{transform_indices = @transform_0, window_bounds = array<i64: 4, 288, 128>}, {pipeline_mode = #tpu.pipeline_mode<synchronous>, transform_indices = @transform_1, window_bounds = array<i64: 64, 288>}, {pipeline_mode = #tpu.pipeline_mode<synchronous>, transform_indices = @transform_2, window_bounds = array<i64: 64, 1>}, {transform_indices = @transform_3, window_bounds = array<i64: 64, 128>}]} {
    %c0 = arith.constant 0 : index
    %c0_0 = arith.constant 0 : index
    %0 = vector.load %arg2[%c0, %c0_0] : memref<64x288xbf16, #tpu.memory_space<vmem>>, vector<64x288xbf16>
    %c0_1 = arith.constant 0 : index
    %c0_2 = arith.constant 0 : index
    %c0_3 = arith.constant 0 : index
    %1 = vector.load %arg1[%c0_1, %c0_2, %c0_3] : memref<4x288x128xbf16, #tpu.memory_space<vmem>>, vector<1x288x128xbf16>
    %2 = vector.shape_cast %1 : vector<1x288x128xbf16> to vector<288x128xbf16>
    %cst = arith.constant dense<0.000000e+00> : vector<64x128xf32>
    %3 = tpu.matmul %0, %2, %cst {dimension_numbers = #tpu.dot_dimension_numbers<[1], [0], [0], [1], [0, 0, 1, 1], [], []>} : vector<64x288xbf16>, vector<288x128xbf16>, vector<64x128xf32> -> vector<64x128xf32>
    %c1 = arith.constant 1 : index
    %c0_4 = arith.constant 0 : index
    %c0_5 = arith.constant 0 : index
    %4 = vector.load %arg1[%c1, %c0_4, %c0_5] : memref<4x288x128xbf16, #tpu.memory_space<vmem>>, vector<1x288x128xbf16>
    %5 = vector.shape_cast %4 : vector<1x288x128xbf16> to vector<288x128xbf16>
    %cst_6 = arith.constant dense<0.000000e+00> : vector<64x128xf32>
    %6 = tpu.matmul %0, %5, %cst_6 {dimension_numbers = #tpu.dot_dimension_numbers<[1], [0], [0], [1], [0, 0, 1, 1], [], []>} : vector<64x288xbf16>, vector<288x128xbf16>, vector<64x128xf32> -> vector<64x128xf32>
    %7 = arith.maximumf %3, %6 : vector<64x128xf32>
    %c2 = arith.constant 2 : index
    %c0_7 = arith.constant 0 : index
    %c0_8 = arith.constant 0 : index
    %8 = vector.load %arg1[%c2, %c0_7, %c0_8] : memref<4x288x128xbf16, #tpu.memory_space<vmem>>, vector<1x288x128xbf16>
    %9 = vector.shape_cast %8 : vector<1x288x128xbf16> to vector<288x128xbf16>
    %cst_9 = arith.constant dense<0.000000e+00> : vector<64x128xf32>
    %10 = tpu.matmul %0, %9, %cst_9 {dimension_numbers = #tpu.dot_dimension_numbers<[1], [0], [0], [1], [0, 0, 1, 1], [], []>} : vector<64x288xbf16>, vector<288x128xbf16>, vector<64x128xf32> -> vector<64x128xf32>
    %11 = arith.maximumf %7, %10 : vector<64x128xf32>
    %c3 = arith.constant 3 : index
    %c0_10 = arith.constant 0 : index
    %c0_11 = arith.constant 0 : index
    %12 = vector.load %arg1[%c3, %c0_10, %c0_11] : memref<4x288x128xbf16, #tpu.memory_space<vmem>>, vector<1x288x128xbf16>
    %13 = vector.shape_cast %12 : vector<1x288x128xbf16> to vector<288x128xbf16>
    %cst_12 = arith.constant dense<0.000000e+00> : vector<64x128xf32>
    %14 = tpu.matmul %0, %13, %cst_12 {dimension_numbers = #tpu.dot_dimension_numbers<[1], [0], [0], [1], [0, 0, 1, 1], [], []>} : vector<64x288xbf16>, vector<288x128xbf16>, vector<64x128xf32> -> vector<64x128xf32>
    %15 = arith.maximumf %11, %14 : vector<64x128xf32>
    %c0_13 = arith.constant 0 : index
    %c0_14 = arith.constant 0 : index
    %16 = vector.load %arg3[%c0_13, %c0_14] : memref<64x1xf32, #tpu.memory_space<vmem>>, vector<64x1xf32>
    %17 = vector.broadcast %16 : vector<64x1xf32> to vector<64x128xf32>
    %18 = arith.addf %15, %17 : vector<64x128xf32>
    %cst_15 = arith.constant 0.000000e+00 : f32
    %19 = vector.broadcast %cst_15 : f32 to vector<64x128xf32>
    %20 = arith.maximumf %18, %19 : vector<64x128xf32>
    %c0_16 = arith.constant 0 : index
    %c0_17 = arith.constant 0 : index
    %21 = vector.load %arg4[%c0_16, %c0_17] : memref<64x128xf32, #tpu.memory_space<vmem>>, vector<64x128xf32>
    tpu.vector_store %arg4[%c0_16, %c0_17], %20 {strides = array<i32>} : memref<64x128xf32, #tpu.memory_space<vmem>>, vector<64x128xf32>,
    return
  }
  func.func @transform_0(%arg0: i32) -> (i32, i32, i32) {
    %c0_i32 = arith.constant 0 : i32
    %c0_i32_0 = arith.constant 0 : i32
    %c0_i32_1 = arith.constant 0 : i32
    return %c0_i32, %c0_i32_0, %arg0 : i32, i32, i32
  }
  func.func @transform_1(%arg0: i32) -> (i32, i32) {
    %c0_i32 = arith.constant 0 : i32
    %c0_i32_0 = arith.constant 0 : i32
    %c0_i32_1 = arith.constant 0 : i32
    return %c0_i32, %c0_i32_0 : i32, i32
  }
  func.func @transform_2(%arg0: i32) -> (i32, i32) {
    %c0_i32 = arith.constant 0 : i32
    %c0_i32_0 = arith.constant 0 : i32
    %c0_i32_1 = arith.constant 0 : i32
    return %c0_i32, %c0_i32_0 : i32, i32
  }
  func.func @transform_3(%arg0: i32) -> (i32, i32) {
    %c0_i32 = arith.constant 0 : i32
    %c0_i32_0 = arith.constant 0 : i32
    return %c0_i32, %arg0 : i32, i32
  }
}

module attributes {stable_mosaic.version = 11 : i64} {
  func.func @_linear_kernel(%arg0: i32, %arg1: memref<8x3136xbf16, #tpu.memory_space<vmem>>, %arg2: memref<3136x62xbf16, #tpu.memory_space<vmem>>, %arg3: memref<1x62xf32, #tpu.memory_space<vmem>>, %arg4: memref<8x62xf32, #tpu.memory_space<vmem>>) attributes {dimension_semantics = [#tpu.dimension_semantics<parallel>], iteration_bounds = array<i64: 1>, scalar_prefetch = 0 : i64, scratch_operands = 0 : i64, tpu.core_type = #tpu.core_type<tc>, window_params = [{transform_indices = @transform_0, window_bounds = array<i64: 8, 3136>}, {pipeline_mode = #tpu.pipeline_mode<synchronous>, transform_indices = @transform_1, window_bounds = array<i64: 3136, 62>}, {pipeline_mode = #tpu.pipeline_mode<synchronous>, transform_indices = @transform_2, window_bounds = array<i64: 1, 62>}, {transform_indices = @transform_3, window_bounds = array<i64: 8, 62>}]} {
    %c0 = arith.constant 0 : index
    %c0_0 = arith.constant 0 : index
    %0 = vector.load %arg1[%c0, %c0_0] : memref<8x3136xbf16, #tpu.memory_space<vmem>>, vector<8x3136xbf16>
    %c0_1 = arith.constant 0 : index
    %c0_2 = arith.constant 0 : index
    %1 = vector.load %arg2[%c0_1, %c0_2] : memref<3136x62xbf16, #tpu.memory_space<vmem>>, vector<3136x62xbf16>
    %cst = arith.constant dense<0.000000e+00> : vector<8x62xf32>
    %2 = tpu.matmul %0, %1, %cst {dimension_numbers = #tpu.dot_dimension_numbers<[1], [0], [0], [1], [0, 0, 1, 1], [], []>} : vector<8x3136xbf16>, vector<3136x62xbf16>, vector<8x62xf32> -> vector<8x62xf32>
    %c0_3 = arith.constant 0 : index
    %c0_4 = arith.constant 0 : index
    %3 = vector.load %arg3[%c0_3, %c0_4] : memref<1x62xf32, #tpu.memory_space<vmem>>, vector<1x62xf32>
    %4 = vector.broadcast %3 : vector<1x62xf32> to vector<8x62xf32>
    %5 = arith.addf %2, %4 : vector<8x62xf32>
    %c0_5 = arith.constant 0 : index
    %c0_6 = arith.constant 0 : index
    %6 = vector.load %arg4[%c0_5, %c0_6] : memref<8x62xf32, #tpu.memory_space<vmem>>, vector<8x62xf32>
    tpu.vector_store %arg4[%c0_5, %c0_6], %5 {strides = array<i32>} : memref<8x62xf32, #tpu.memory_space<vmem>>, vector<8x62xf32>,
    return
  }
  func.func @transform_0(%arg0: i32) -> (i32, i32) {
    %c0_i32 = arith.constant 0 : i32
    %c0_i32_0 = arith.constant 0 : i32
    return %arg0, %c0_i32 : i32, i32
  }
  func.func @transform_1(%arg0: i32) -> (i32, i32) {
    %c0_i32 = arith.constant 0 : i32
    %c0_i32_0 = arith.constant 0 : i32
    %c0_i32_1 = arith.constant 0 : i32
    return %c0_i32, %c0_i32_0 : i32, i32
  }
  func.func @transform_2(%arg0: i32) -> (i32, i32) {
    %c0_i32 = arith.constant 0 : i32
    %c0_i32_0 = arith.constant 0 : i32
    %c0_i32_1 = arith.constant 0 : i32
    return %c0_i32, %c0_i32_0 : i32, i32
  }
  func.func @transform_3(%arg0: i32) -> (i32, i32) {
    %c0_i32 = arith.constant 0 : i32
    %c0_i32_0 = arith.constant 0 : i32
    return %arg0, %c0_i32 : i32, i32
  }
}

</mosaic_0001>

<bundles_post_ra>
// kernel: cnn_femnist_forward.3
= control target key start
LH: loop header
LB: loop body
LE: loop exit
PB: predicated region body
PF: predicated region fallthrough
CT: control target
= control target key end

     0   :  { %s1109_s12 = smov 0   ;;  %s1111_s13 = smov 0   ;;  %s1318_s0 = inlined_call_operand.vmem [shape: bf16[4,49,512], index: 0, kind: input, shape index: {}]   ;;  %s1319_s1 = inlined_call_operand.vmem [shape: bf16[32,49], index: 1, kind: input, shape index: {}]   ;;  %s1320_s2 = inlined_call_operand.vmem [shape: f32[32,1], index: 2, kind: input, shape index: {}]   ;;  %s1321_s3 = inlined_call_operand.vmem [shape: f32[32,512], index: 3, kind: output, shape index: {}]  }
   0x1   :  { %s1113_s14 = smov 0  }
   0x2 LB: > { %s911_s15 = sadd.s32 4294967295, %s1086_s14   ;;  %s1126_s16 = sadd.s32 1, %s1086_s14   ;;  %s1086_s14 = sphi %s1113_s14, %s1325_s14   ;;  %s1082_s13 = sphi %s1111_s13, %s1324_s13   ;;  %s1078_s12 = sphi %s1109_s12, %s1323_s12  }
   0x3   : > { %s17_s17 = ssub.s32 %s1086_s14, %s1126_s16  ;;  %s20_s18 = sadd.s32 1, %s1082_s13 }
   0x4   : > { %p18_p0 = scmp.eq.s32.totalorder %s17_s17, 0  ;;  %p27_p1 = scmp.ne.s32.totalorder %s1082_s13, %s1078_s12 }
   0x5   : > { %p28_p2 = scmp.eq.s32.totalorder %s1086_s14, 0  ;;  %p99_p3 = scmp.eq.s32.totalorder %s911_s15, 1 }
   0x6   : > { %s1137_s19 = scalar_select %p18_p0, %s1082_s13, %s20_s18  }
   0x7   : > { %p29_p4 = por %p28_p2, %p27_p1  ;;  %p1139_p5 = por %p99_p3, %p27_p1 }
   0x8   : > { %p914_p6 = scmp.ge.s32.totalorder %s1086_s14, 2 }
   0xa   : > { %127 = sbr.rel (%p914_p6) target bundleno = 35 (0x23), region = 24 }
  0x11   : > { %130 = sbr.rel (!%p29_p4) target bundleno = 35 (0x23), region = 28  ;;  %s132_s21 = sand.u32 (%p29_p4), 1, %s1082_s13  }
  0x12   : > { %s987_s22 = sshll.u32 (%p29_p4), %s1086_s14, 3  ;;  %s989_s23 = smul.u32 (%p29_p4), 224, %s132_s21 }
  0x13   : > { %s1149_s26 = scalar_lea.vmem (%p29_p4), %s1318_s0, %s987_s22 }
  0x14   : > { %v219_v0 = vld [vmem:[%s1149_s26] sm:$0xff] (%p29_p4)  ;;  %v221_v1 = vld [vmem:[%s1149_s26 + $0x10] sm:$0xff] (%p29_p4)  ;;  %s1157_s27 = scalar_lea.vmem (%p29_p4), [#allocation2], %s989_s23 }
  0x15   : > { %v223_v2 = vld [vmem:[%s1149_s26 + $0x20] sm:$0xff] (%p29_p4)  ;;  %v225_v3 = vld [vmem:[%s1149_s26 + $0x30] sm:$0xff] (%p29_p4)  ;;  %220 = vst [vmem:[%s1157_s27] sm:$0xff] (%p29_p4), %v219_v0  ;;  %222 = vst [vmem:[%s1157_s27 + $0x8] sm:$0xff] (%p29_p4), %v221_v1 }
  0x16   : > { %v227_v4 = vld [vmem:[%s1149_s26 + $0x40] sm:$0xff] (%p29_p4)  ;;  %v229_v5 = vld [vmem:[%s1149_s26 + $0x50] sm:$0xff] (%p29_p4)  ;;  %224 = vst [vmem:[%s1157_s27 + $0x10] sm:$0xff] (%p29_p4), %v223_v2  ;;  %226 = vst [vmem:[%s1157_s27 + $0x18] sm:$0xff] (%p29_p4), %v225_v3 }
  0x17   : > { %228 = vst [vmem:[%s1157_s27 + $0x20] sm:$0xff] (%p29_p4), %v227_v4  ;;  %230 = vst [vmem:[%s1157_s27 + $0x28] sm:$0xff] (%p29_p4), %v229_v5  ;;  %v231_v6 = vld [vmem:[%s1149_s26 + $0x60] sm:$0xff] (%p29_p4)  ;;  %v233_v7 = vld [vmem:[%s1149_s26 + $0x70] sm:$0xff] (%p29_p4) }
  0x18   : > { %v235_v8 = vld [vmem:[%s1149_s26 + $0x80] sm:$0xff]  ;;  %232 = vst [vmem:[%s1157_s27 + $0x30] sm:$0xff] %v231_v6  ;;  %234 = vst [vmem:[%s1157_s27 + $0x38] sm:$0xff] %v233_v7  ;;  %v237_v9 = vld [vmem:[%s1149_s26 + $0x90] sm:$0xff] }
  0x19   : > { %236 = vst [vmem:[%s1157_s27 + $0x40] sm:$0xff] %v235_v8  ;;  %v239_v10 = vld [vmem:[%s1149_s26 + $0xa0] sm:$0xff]  ;;  %v241_v11 = vld [vmem:[%s1149_s26 + $0xb0] sm:$0xff]  ;;  %238 = vst [vmem:[%s1157_s27 + $0x48] sm:$0xff] %v237_v9 }
  0x1a   : > { %240 = vst [vmem:[%s1157_s27 + $0x50] sm:$0xff] %v239_v10  ;;  %242 = vst [vmem:[%s1157_s27 + $0x58] sm:$0xff] %v241_v11  ;;  %v243_v12 = vld [vmem:[%s1149_s26 + $0xc0] sm:$0xff]  ;;  %v245_v13 = vld [vmem:[%s1149_s26 + $0xd0] sm:$0xff] }
  0x1b   : > { %v247_v14 = vld [vmem:[%s1149_s26 + $0xe0] sm:$0xff]  ;;  %244 = vst [vmem:[%s1157_s27 + $0x60] sm:$0xff] %v243_v12  ;;  %246 = vst [vmem:[%s1157_s27 + $0x68] sm:$0xff] %v245_v13  ;;  %v249_v15 = vld [vmem:[%s1149_s26 + $0xf0] sm:$0xff] }
  0x1c   : > { %248 = vst [vmem:[%s1157_s27 + $0x70] sm:$0xff] %v247_v14  ;;  %v251_v16 = vld [vmem:[%s1149_s26 + $0x100] sm:$0xff]  ;;  %v253_v17 = vld [vmem:[%s1149_s26 + $0x110] sm:$0xff]  ;;  %250 = vst [vmem:[%s1157_s27 + $0x78] sm:$0xff] %v249_v15 }
  0x1d   : > { %252 = vst [vmem:[%s1157_s27 + $0x80] sm:$0xff] %v251_v16  ;;  %254 = vst [vmem:[%s1157_s27 + $0x88] sm:$0xff] %v253_v17  ;;  %v255_v18 = vld [vmem:[%s1149_s26 + $0x120] sm:$0xff]  ;;  %v257_v19 = vld [vmem:[%s1149_s26 + $0x130] sm:$0xff] }
  0x1e   : > { %v259_v20 = vld [vmem:[%s1149_s26 + $0x140] sm:$0xff]  ;;  %256 = vst [vmem:[%s1157_s27 + $0x90] sm:$0xff] %v255_v18  ;;  %258 = vst [vmem:[%s1157_s27 + $0x98] sm:$0xff] %v257_v19  ;;  %v261_v21 = vld [vmem:[%s1149_s26 + $0x150] sm:$0xff] }
  0x1f   : > { %260 = vst [vmem:[%s1157_s27 + $0xa0] sm:$0xff] %v259_v20  ;;  %v263_v22 = vld [vmem:[%s1149_s26 + $0x160] sm:$0xff]  ;;  %v265_v23 = vld [vmem:[%s1149_s26 + $0x170] sm:$0xff]  ;;  %262 = vst [vmem:[%s1157_s27 + $0xa8] sm:$0xff] %v261_v21 }
  0x20   : > { %264 = vst [vmem:[%s1157_s27 + $0xb0] sm:$0xff] %v263_v22  ;;  %266 = vst [vmem:[%s1157_s27 + $0xb8] sm:$0xff] %v265_v23  ;;  %v267_v24 = vld [vmem:[%s1149_s26 + $0x180] sm:$0xff]  ;;  %v269_v25 = vld [vmem:[%s1149_s26 + $0x190] sm:$0xff] }
  0x21   : > { %v271_v26 = vld [vmem:[%s1149_s26 + $0x1a0] sm:$0xff]  ;;  %268 = vst [vmem:[%s1157_s27 + $0xc0] sm:$0xff] %v267_v24  ;;  %270 = vst [vmem:[%s1157_s27 + $0xc8] sm:$0xff] %v269_v25  ;;  %v273_v27 = vld [vmem:[%s1149_s26 + $0x1b0] sm:$0xff] }
  0x22   : > { %272 = vst [vmem:[%s1157_s27 + $0xd0] sm:$0xff] %v271_v26  ;;  %274 = vst [vmem:[%s1157_s27 + $0xd8] sm:$0xff] %v273_v27 }
  0x23 PF: > { %p917_p7 = scmp.ge.s32.totalorder %s1086_s14, 1  ;;  %p279_p8 = scmp.lt.s32.totalorder %s1086_s14, 3 }
  0x25   : > { %p280_p9 = pnand %p917_p7, %p279_p8 }
  0x26   : > { %s286_s28 = sand.u32 (!%p280_p9), 1, %s1078_s12   ;;  %v1088_v28 = vmov (!%p280_p9), 0   ;;  %v766_v29 = vld [vmem:[%s1320_s2] sm:$0xff] (!%p280_p9)  ;;  %v767_v30 = vld [vmem:[%s1320_s2 + $0x8] sm:$0xff] (!%p280_p9)  ;;  %v768_v31 = vld [vmem:[%s1320_s2 + $0x10] sm:$0xff] (!%p280_p9)  ;;  %vm374_vm0 = vcmask (!%p280_p9), 1040384  }
  0x27   : > { %283 = sbr.rel (%p280_p9) target bundleno = 317 (0x13d), region = 66  ;;  %415 = vmatprep.mubr.bf16.mxu0 (!%p280_p9), %v1088_v28  ;;  %517 = vmatprep.mubr.bf16.mxu1 (!%p280_p9), %v1088_v28  ;;  %v769_v33 = vld [vmem:[%s1320_s2 + $0x18] sm:$0xff] (!%p280_p9)  ;;  %v376_v46 = vsel (!%p280_p9), %vm374_vm0, 65535, %v1088_v28  ;;  %v1040_v58 = vld [vmem:[%s1319_s1] sm:$0xff] (!%p280_p9)   ;;  %vm367_vm1 = vcmask (!%p280_p9), 400384   ;;  %v1053_v7 = vld [vmem:[%s1319_s1 + $0x8] sm:$0xff] (!%p280_p9)  }
  0x28   : > { %s990_s29 = smul.u32 (!%p280_p9), 224, %s286_s28  ;;  %1016 = vset.pattern.permute.xlu0 (!%p280_p9), %v1088_v28  ;;  %1017 = vset.pattern.permute.xlu1 (!%p280_p9), %v1088_v28  ;;  %s918_s23 = sshll.u32 (!%p280_p9), %s286_s28, 6 }
  0x29   : > { %772 = vperm.xlu0 (!%p280_p9), %1016, %v766_v29   ;;  %782 = vperm.xlu1 (!%p280_p9), %1017, %v768_v31   ;;  %s1283_s24 = scalar_lea.vmem (!%p280_p9), [#allocation3], %s918_s23 }
  0x2a   : > { %s1227_s9 = scalar_lea.vmem (!%p280_p9), [#allocation2], %s990_s29 }
  0x2b   : > { %v1018_v32 = vld [vmem:[%s1227_s9 + $0x4] ss:$8 sps:$4 sm:$0xff] (!%p280_p9)   ;;  %v1022_v35 = vld [vmem:[%s1227_s9] ss:$8 sps:$4 sm:$0xff] (!%p280_p9)   ;;  %v1024_v37 = vld [vmem:[%s1227_s9 + $0x14] ss:$8 sps:$4 sm:$0xff] (!%p280_p9)  }
  0x2c   : > { %v1020_v34 = vld [vmem:[%s1227_s9 + $0x3c] ss:$8 sps:$4 sm:$0xff] (!%p280_p9)   ;;  %383 = vmatprep.subr.bf16.mxu0 (!%p280_p9), %v1018_v32  ;;  %v1023_v36 = vld [vmem:[%s1227_s9 + $0x38] ss:$8 sps:$4 sm:$0xff] (!%p280_p9)   ;;  %v1026_v38 = vld [vmem:[%s1227_s9 + $0x4c] ss:$8 sps:$4 sm:$0xff] (!%p280_p9)  }
  0x2d   : > { %485 = vmatprep.subr.bf16.mxu1 (!%p280_p9), %v1020_v34  ;;  %777 = vperm.xlu0 (!%p280_p9), %1016, %v767_v30   ;;  %v1028_v39 = vld [vmem:[%s1227_s9 + $0x10] ss:$8 sps:$4 sm:$0xff] (!%p280_p9)   ;;  %v1030_v41 = vld [vmem:[%s1227_s9 + $0x24] ss:$8 sps:$4 sm:$0xff] (!%p280_p9)   ;;  %v1034_v43 = vld [vmem:[%s1227_s9 + $0x20] ss:$8 sps:$4 sm:$0xff] (!%p280_p9)  }
  0x2e   : > { %384 = vmatpush1.bf16.msra.mxu0 %v1022_v35  ;;  %486 = vmatpush1.bf16.msra.mxu1 %v1023_v36  ;;  %v1029_v40 = vld [vmem:[%s1227_s9 + $0x48] ss:$8 sps:$4 sm:$0xff]   ;;  %v1032_v42 = vld [vmem:[%s1227_s9 + $0x5c] ss:$8 sps:$4 sm:$0xff]   ;;  %v1035_v44 = vld [vmem:[%s1227_s9 + $0x58] ss:$8 sps:$4 sm:$0xff]  }
  0x2f   : > { %385 = vmatprep.subr.bf16.mxu0 %v1024_v37  ;;  %787 = vperm.xlu1 %1017, %v769_v33   ;;  %v321_v45 = vld [vmem:[%s1227_s9 + $0x30] sm:$0x11]  ;;  %v937_v47 = vld [vmem:[%s1227_s9 + $0x68] sm:$0x11]  ;;  %v1052_v62 = vld [vmem:[%s1227_s9 + $0xbc] ss:$8 sps:$4 sm:$0xff]  }
  0x30   : > { %487 = vmatprep.subr.bf16.mxu1 %v1026_v38  ;;  %v928_v48 = vcombine.high %v321_v45, %v321_v45  ;;  %v945_v49 = vcombine.high %v937_v47, %v937_v47  ;;  %v927_v50 = vcombine.low %v321_v45, %v321_v45  ;;  %v944_v51 = vcombine.low %v937_v47, %v937_v47  ;;  %v1043_v56 = vld [vmem:[%s1227_s9 + $0x74] ss:$8 sps:$4 sm:$0xff]   ;;  %v1041_v59 = vld [vmem:[%s1227_s9 + $0x70] ss:$8 sps:$4 sm:$0xff]   ;;  %v1049_v61 = vld [vmem:[%s1227_s9 + $0x84] ss:$8 sps:$4 sm:$0xff]  }
  0x31   : > { %v1046_v57 = vld [vmem:[%s1227_s9 + $0xac] ss:$8 sps:$4 sm:$0xff]   ;;  %v1044_v60 = vld [vmem:[%s1227_s9 + $0xa8] ss:$8 sps:$4 sm:$0xff]   ;;  %v954_v63 = vld [vmem:[%s1227_s9 + $0xa0] sm:$0x11] }
  0x32   : > { %386 = vmatpush1.bf16.msra.mxu0 %v1028_v39  ;;  %488 = vmatpush1.bf16.msra.mxu1 %v1029_v40  ;;  %v381_v52 = vand.u32 %v928_v48, %v376_v46  ;;  %v483_v53 = vand.u32 %v945_v49, %v376_v46  ;;  %v378_v54 = vand.u32 %v927_v50, %v376_v46  ;;  %v971_v0 = vld [vmem:[%s1227_s9 + $0xd8] sm:$0x11]  ;;  %v1047_v1 = vld [vmem:[%s1227_s9 + $0x80] ss:$8 sps:$4 sm:$0xff]   ;;  %v1059_v4 = vld [vmem:[%s1227_s9 + $0xcc] ss:$8 sps:$4 sm:$0xff]  }
  0x33   : > { %387 = vmatprep.subr.bf16.mxu0 %v1030_v41  ;;  %489 = vmatprep.subr.bf16.mxu1 %v1032_v42  ;;  %v480_v55 = vand.u32 %v944_v51, %v376_v46  ;;  %v1050_v2 = vld [vmem:[%s1227_s9 + $0xb8] ss:$8 sps:$4 sm:$0xff]   ;;  %v1056_v3 = vld [vmem:[%s1227_s9 + $0x94] ss:$8 sps:$4 sm:$0xff]   ;;  %v962_v5 = vcombine.high %v954_v63, %v954_v63  ;;  %v979_v6 = vcombine.high %v971_v0, %v971_v0  ;;  %v1057_v9 = vld [vmem:[%s1227_s9 + $0xc8] ss:$8 sps:$4 sm:$0xff]  }
  0x34   : > { %v1054_v8 = vld [vmem:[%s1227_s9 + $0x90] ss:$8 sps:$4 sm:$0xff]   ;;  %v961_v10 = vcombine.low %v954_v63, %v954_v63  ;;  %v978_v11 = vcombine.low %v971_v0, %v971_v0  ;;  %s988_s12 = sshll.u32 (%p1139_p5), %s911_s15, 4 }
  0x35   : > { %v593_v12 = vand.u32 %v962_v5, %v376_v46  ;;  %v703_v13 = vand.u32 %v979_v6, %v376_v46  ;;  %s823_s27 = scalar_lea.vmem (%p1139_p5), %s1321_s3, %s988_s12 }
  0x36   : > { %388 = vmatpush1.bf16.msra.mxu0 %v1034_v43  ;;  %490 = vmatpush1.bf16.msra.mxu1 %v1035_v44  ;;  %v590_v14 = vand.u32 %v961_v10, %v376_v46  ;;  %v700_v15 = vand.u32 %v978_v11, %v376_v46 }
  0x37   : > { %389 = vmatprep.subr.bf16.mxu0 %v381_v52  ;;  %491 = vmatprep.subr.bf16.mxu1 %v483_v53 }
  0x3a   : > { %390 = vmatpush1.bf16.msra.mxu0 %v378_v54  ;;  %492 = vmatpush1.bf16.msra.mxu1 %v480_v55 }
  0x3b   : > { %595 = vmatprep.subr.bf16.mxu0 %v1043_v56  ;;  %705 = vmatprep.subr.bf16.mxu1 %v1046_v57 }
  0x3d   : > { %929 = vmatmul.mubr.msk.bf16.vlgmr.msra.gmra.mrb[0].mxu0 %vm367_vm1, %v1040_v58  ;;  %946 = vmatmul.mubr.msk.bf16.vlgmr.msra.gmra.mrb[0].mxu1 %vm367_vm1, %v1040_v58 }
  0x3e   : > { %596 = vmatpush1.bf16.msra.mxu0 %v1041_v59  ;;  %706 = vmatpush1.bf16.msra.mxu1 %v1044_v60 }
  0x3f   : > { %597 = vmatprep.subr.bf16.mxu0 %v1049_v61  ;;  %707 = vmatprep.subr.bf16.mxu1 %v1052_v62 }
  0x40   : > { %425 = vmatprep.mubr.bf16.mxu0 %v1088_v28  ;;  %527 = vmatprep.mubr.bf16.mxu1 %v1088_v28 }
  0x42   : > { %598 = vmatpush1.bf16.msra.mxu0 %v1047_v1  ;;  %708 = vmatpush1.bf16.msra.mxu1 %v1050_v2 }
  0x43   : > { %599 = vmatprep.subr.bf16.mxu0 %v1056_v3  ;;  %709 = vmatprep.subr.bf16.mxu1 %v1059_v4 }
  0x45   : > { %930 = vmatmul.mubr.msk.bf16.gmra.mrb[4].mxu0 %vm367_vm1, %v1053_v7  ;;  %947 = vmatmul.mubr.msk.bf16.gmra.mrb[4].mxu1 %vm367_vm1, %v1053_v7 }
  0x46   : > { %600 = vmatpush1.bf16.msra.mxu0 %v1054_v8  ;;  %710 = vmatpush1.bf16.msra.mxu1 %v1057_v9 }
  0x47   : > { %601 = vmatprep.subr.bf16.mxu0 %v593_v12  ;;  %711 = vmatprep.subr.bf16.mxu1 %v703_v13 }
  0x48   : > { %627 = vmatprep.mubr.bf16.mxu0 %v1088_v28  ;;  %737 = vmatprep.mubr.bf16.mxu1 %v1088_v28 }
  0x4a   : > { %602 = vmatpush1.bf16.msra.mxu0 %v590_v14  ;;  %712 = vmatpush1.bf16.msra.mxu1 %v700_v15 }
  0x4d   : > { %963 = vmatmul.mubr.msk.bf16.vlgmr.msra.gmra.mrb[8].mxu0 %vm367_vm1, %v1040_v58  ;;  %980 = vmatmul.mubr.msk.bf16.vlgmr.msra.gmra.mrb[8].mxu1 %vm367_vm1, %v1040_v58 }
  0x4e   : > { %637 = vmatprep.mubr.bf16.mxu0 %v1088_v28  ;;  %747 = vmatprep.mubr.bf16.mxu1 %v1088_v28 }
  0x55   : > { %964 = vmatmul.mubr.msk.bf16.gmra.mrb[12].mxu0 %vm367_vm1, %v1053_v7  ;;  %981 = vmatmul.mubr.msk.bf16.gmra.mrb[12].mxu1 %vm367_vm1, %v1053_v7 }
  0xa8   : > { %v773_v40 = vpop.permute.xlu0 %772  ;;  %v783_v62 = vpop.permute.xlu1 %782 }
  0xac   : > { %v778_v55 = vpop.permute.xlu0 %777 }
 0x110   : > { %v417_v16 = vpop.f32.mrb[0].mxu0  ;;  %v519_v17 = vpop.f32.mrb[0].mxu1 }
 0x111   : > { %v538_v18 = vmax.f32 %v417_v16, %v519_v17  ;;  %v419_v19 = vpop.f32.mrb[1].mxu0  ;;  %v521_v20 = vpop.f32.mrb[1].mxu1 }
 0x112   : > { %v539_v21 = vmax.f32 %v419_v19, %v521_v20  ;;  %v421_v22 = vpop.f32.mrb[2].mxu0  ;;  %v523_v23 = vpop.f32.mrb[2].mxu1 }
 0x113   : > { %v540_v24 = vmax.f32 %v421_v22, %v523_v23  ;;  %v423_v25 = vpop.f32.mrb[3].mxu0  ;;  %v525_v26 = vpop.f32.mrb[3].mxu1 }
 0x114   : > { %v541_v27 = vmax.f32 %v423_v25, %v525_v26 }
 0x118   : > { %v427_v29 = vpop.f32.mrb[4].mxu0  ;;  %v529_v30 = vpop.f32.mrb[4].mxu1 }
 0x119   : > { %v542_v31 = vmax.f32 %v427_v29, %v529_v30  ;;  %v429_v28 = vpop.f32.mrb[5].mxu0  ;;  %v531_v32 = vpop.f32.mrb[5].mxu1 }
 0x11a   : > { %v543_v33 = vmax.f32 %v429_v28, %v531_v32  ;;  %v431_v34 = vpop.f32.mrb[6].mxu0  ;;  %v533_v35 = vpop.f32.mrb[6].mxu1 }
 0x11b   : > { %v544_v36 = vmax.f32 %v431_v34, %v533_v35  ;;  %v433_v37 = vpop.f32.mrb[7].mxu0  ;;  %v535_v38 = vpop.f32.mrb[7].mxu1 }
 0x11c   : > { %v545_v39 = vmax.f32 %v433_v37, %v535_v38 }
 0x120   : > { %v629_v41 = vpop.f32.mrb[8].mxu0  ;;  %v739_v42 = vpop.f32.mrb[8].mxu1 }
 0x121   : > { %v648_v43 = vmax.f32 %v538_v18, %v629_v41  ;;  %v631_v44 = vpop.f32.mrb[9].mxu0  ;;  %v741_v45 = vpop.f32.mrb[9].mxu1 }
 0x122   : > { %v649_v46 = vmax.f32 %v539_v21, %v631_v44  ;;  %v633_v47 = vpop.f32.mrb[10].mxu0  ;;  %v743_v48 = vpop.f32.mrb[10].mxu1 }
 0x123   : > { %v758_v49 = vmax.f32 %v648_v43, %v739_v42  ;;  %v650_v50 = vmax.f32 %v540_v24, %v633_v47  ;;  %v635_v51 = vpop.f32.mrb[11].mxu0  ;;  %v745_v52 = vpop.f32.mrb[11].mxu1 }
 0x124   : > { %v759_v53 = vmax.f32 %v649_v46, %v741_v45  ;;  %v651_v54 = vmax.f32 %v541_v27, %v635_v51  ;;  %v788_v21 = vpop.permute.xlu1 %787 }
 0x125   : > { %v790_v56 = vadd.f32 %v773_v40, %v758_v49  ;;  %v760_v57 = vmax.f32 %v650_v50, %v743_v48 }
 0x126   : > { %v791_v58 = vadd.f32 %v773_v40, %v759_v53  ;;  %v761_v59 = vmax.f32 %v651_v54, %v745_v52 }
 0x127   : > { %v798_v60 = vmax.f32 %v790_v56, 0.0  ;;  %v792_v61 = vadd.f32 %v778_v55, %v760_v57 }
 0x128   : > { %v799_v63 = vmax.f32 %v791_v58, 0.0  ;;  %v793_v0 = vadd.f32 %v778_v55, %v761_v59  ;;  %v639_v1 = vpop.f32.mrb[12].mxu0  ;;  %v749_v2 = vpop.f32.mrb[12].mxu1 }
 0x129   : > { %806 = vst [vmem:[%s1283_s24] sm:$0xff] %v798_v60  ;;  %v800_v3 = vmax.f32 %v792_v61, 0.0  ;;  %v652_v4 = vmax.f32 %v542_v31, %v639_v1  ;;  %v641_v5 = vpop.f32.mrb[13].mxu0  ;;  %v751_v6 = vpop.f32.mrb[13].mxu1 }
 0x12a   : > { %807 = vst [vmem:[%s1283_s24 + $0x8] sm:$0xff] %v799_v63  ;;  %v801_v7 = vmax.f32 %v793_v0, 0.0  ;;  %v653_v8 = vmax.f32 %v543_v33, %v641_v5  ;;  %v643_v9 = vpop.f32.mrb[14].mxu0  ;;  %v753_v10 = vpop.f32.mrb[14].mxu1 }
 0x12b   : > { %808 = vst [vmem:[%s1283_s24 + $0x10] sm:$0xff] %v800_v3  ;;  %v762_v11 = vmax.f32 %v652_v4, %v749_v2  ;;  %v654_v12 = vmax.f32 %v544_v36, %v643_v9  ;;  %v645_v13 = vpop.f32.mrb[15].mxu0  ;;  %v755_v14 = vpop.f32.mrb[15].mxu1 }
 0x12c   : > { %809 = vst [vmem:[%s1283_s24 + $0x18] sm:$0xff] %v801_v7  ;;  %v763_v15 = vmax.f32 %v653_v8, %v751_v6  ;;  %v655_v16 = vmax.f32 %v545_v39, %v645_v13 }
 0x12d   : > { %v794_v17 = vadd.f32 %v783_v62, %v762_v11  ;;  %v764_v18 = vmax.f32 %v654_v12, %v753_v10 }
 0x12e   : > { %v795_v19 = vadd.f32 %v783_v62, %v763_v15  ;;  %v765_v20 = vmax.f32 %v655_v16, %v755_v14  ;;  %820 = sbr.rel (!%p1139_p5) target bundleno = 317 (0x13d), region = 74 }
 0x12f   : > { %v802_v22 = vmax.f32 %v794_v17, 0.0  ;;  %v796_v23 = vadd.f32 %v788_v21, %v764_v18 }
 0x130   : > { %v803_v24 = vmax.f32 %v795_v19, 0.0  ;;  %v797_v25 = vadd.f32 %v788_v21, %v765_v20  ;;  %v836_v29 = vld [vmem:[%s1283_s24] sm:$0xff] (%p1139_p5) }
 0x131   : > { %810 = vst [vmem:[%s1283_s24 + $0x20] sm:$0xff] %v802_v22  ;;  %v804_v26 = vmax.f32 %v796_v23, 0.0  ;;  %v838_v30 = vld [vmem:[%s1283_s24 + $0x8] sm:$0xff] (%p1139_p5)  ;;  %837 = vst [vmem:[%s823_s27] sm:$0xff] (%p1139_p5), %v836_v29 }
 0x132   : > { %811 = vst [vmem:[%s1283_s24 + $0x28] sm:$0xff] %v803_v24  ;;  %v805_v27 = vmax.f32 %v797_v25, 0.0  ;;  %v840_v31 = vld [vmem:[%s1283_s24 + $0x10] sm:$0xff] (%p1139_p5)  ;;  %839 = vst [vmem:[%s823_s27 + $0x8] sm:$0xff] (%p1139_p5), %v838_v30 }
 0x133   : > { %812 = vst [vmem:[%s1283_s24 + $0x30] sm:$0xff] %v804_v26  ;;  %v842_v28 = vld [vmem:[%s1283_s24 + $0x18] sm:$0xff] (%p1139_p5)  ;;  %841 = vst [vmem:[%s823_s27 + $0x20] sm:$0xff] (%p1139_p5), %v840_v31 }
 0x134   : > { %813 = vst [vmem:[%s1283_s24 + $0x38] sm:$0xff] %v805_v27  ;;  %843 = vst [vmem:[%s823_s27 + $0x28] sm:$0xff] (%p1139_p5), %v842_v28 }
 0x138   : > { %v844_v32 = vld [vmem:[%s1283_s24 + $0x20] sm:$0xff] }
 0x139   : > { %v846_v33 = vld [vmem:[%s1283_s24 + $0x28] sm:$0xff]  ;;  %845 = vst [vmem:[%s823_s27 + $0x40] sm:$0xff] %v844_v32 }
 0x13a   : > { %847 = vst [vmem:[%s823_s27 + $0x48] sm:$0xff] %v846_v33  ;;  %v848_v34 = vld [vmem:[%s1283_s24 + $0x30] sm:$0xff] }
 0x13b   : > { %v850_v35 = vld [vmem:[%s1283_s24 + $0x38] sm:$0xff]  ;;  %849 = vst [vmem:[%s823_s27 + $0x60] sm:$0xff] %v848_v34 }
 0x13c   : > { %851 = vst [vmem:[%s823_s27 + $0x68] sm:$0xff] %v850_v35 }
 0x13d PF: > { %p10_p10 = scmp.ge.s32.totalorder %s1126_s16, 4   ;;  %s1323_s12 = smov %s1082_s13 }
 0x13e   : > { %s1324_s13 = smov %s1137_s19  ;;  %s1325_s14 = smov %s1126_s16 }
 0x13f   :  { %12 = sbr.rel (!%p10_p10) target bundleno = 2 (0x2), region = 131 }

// kernel: cnn_femnist_forward.4
= control target key start
LH: loop header
LB: loop body
LE: loop exit
PB: predicated region body
PF: predicated region fallthrough
CT: control target
= control target key end

     0   :  { %v1834_v1 = vmov 0   ;;  %vm235_vm0 = vcmask 261120   ;;  %s2288_s0 = inlined_call_operand.vmem [shape: bf16[4,288,128], index: 0, kind: input, shape index: {}]   ;;  %s2289_s1 = inlined_call_operand.vmem [shape: bf16[64,288], index: 1, kind: input, shape index: {}]   ;;  %s2290_s2 = inlined_call_operand.vmem [shape: f32[64,1], index: 2, kind: input, shape index: {}]   ;;  %s2291_s3 = inlined_call_operand.vmem [shape: f32[64,128], index: 3, kind: output, shape index: {}]  }
   0x1   :  { %v1746_v0 = vld [vmem:[%s2288_s0 + $0x40] sm:$0xff]   ;;  %1745 = vset.pattern.permute.xlu1 %v1834_v1  ;;  %1744 = vset.pattern.permute.xlu0 %v1834_v1  ;;  %v1747_v2 = vld [vmem:[%s2288_s0 + $0xd0] sm:$0xff]   ;;  %v1750_v5 = vld [vmem:[%s2288_s0 + $0x48] sm:$0xff]  }
   0x2   :  { %1511 = vmatprep.subr.bf16.mxu0 %v1746_v0  ;;  %v1748_v3 = vld [vmem:[%s2288_s0] sm:$0xff]   ;;  %1557 = vmatprep.subr.bf16.mxu1 %v1747_v2  ;;  %v1749_v4 = vld [vmem:[%s2288_s0 + $0x90] sm:$0xff]   ;;  %v1751_v6 = vld [vmem:[%s2288_s0 + $0xd8] sm:$0xff]  }
   0x3   :  { %1512 = vmatpush3.bf16.msra.mxu0 %v1748_v3  ;;  %1558 = vmatpush3.bf16.msra.mxu1 %v1749_v4  ;;  %v1752_v7 = vld [vmem:[%s2288_s0 + $0x8] sm:$0xff]   ;;  %v1753_v8 = vld [vmem:[%s2288_s0 + $0x98] sm:$0xff]   ;;  %v1754_v9 = vld [vmem:[%s2288_s0 + $0x50] sm:$0xff]  }
   0x4   :  { %1513 = vmatprep.subr.bf16.mxu0 %v1750_v5  ;;  %1559 = vmatprep.subr.bf16.mxu1 %v1751_v6  ;;  %v1755_v10 = vld [vmem:[%s2288_s0 + $0xe0] sm:$0xff]   ;;  %v1756_v11 = vld [vmem:[%s2288_s0 + $0x10] sm:$0xff]   ;;  %v1758_v13 = vld [vmem:[%s2288_s0 + $0x58] sm:$0xff]  }
   0x5   :  { %v1757_v12 = vld [vmem:[%s2288_s0 + $0xa0] sm:$0xff]   ;;  %v1759_v14 = vld [vmem:[%s2288_s0 + $0xe8] sm:$0xff]   ;;  %v1760_v15 = vld [vmem:[%s2288_s0 + $0x18] sm:$0xff]  }
   0x6   :  { %v1761_v16 = vld [vmem:[%s2288_s0 + $0xa8] sm:$0xff]   ;;  %v1762_v17 = vld [vmem:[%s2288_s0 + $0x60] sm:$0xff]   ;;  %v1763_v18 = vld [vmem:[%s2288_s0 + $0xf0] sm:$0xff]  }
   0x7   :  { %1514 = vmatpush3.bf16.msra.mxu0 %v1752_v7  ;;  %1560 = vmatpush3.bf16.msra.mxu1 %v1753_v8  ;;  %v1764_v19 = vld [vmem:[%s2288_s0 + $0x20] sm:$0xff]   ;;  %v1765_v20 = vld [vmem:[%s2288_s0 + $0xb0] sm:$0xff]   ;;  %v1766_v21 = vld [vmem:[%s2288_s0 + $0x68] sm:$0xff]  }
   0x8   :  { %1515 = vmatprep.subr.bf16.mxu0 %v1754_v9  ;;  %1561 = vmatprep.subr.bf16.mxu1 %v1755_v10  ;;  %v1767_v22 = vld [vmem:[%s2288_s0 + $0xf8] sm:$0xff]   ;;  %v1768_v23 = vld [vmem:[%s2288_s0 + $0x28] sm:$0xff]   ;;  %v1770_v25 = vld [vmem:[%s2288_s0 + $0x70] sm:$0xff]  }
   0x9   :  { %v1769_v24 = vld [vmem:[%s2288_s0 + $0xb8] sm:$0xff]   ;;  %v1771_v26 = vld [vmem:[%s2288_s0 + $0x100] sm:$0xff]   ;;  %v1772_v27 = vld [vmem:[%s2288_s0 + $0x30] sm:$0xff]  }
   0xa   :  { %v1773_v28 = vld [vmem:[%s2288_s0 + $0xc0] sm:$0xff]   ;;  %v1774_v29 = vld [vmem:[%s2288_s0 + $0x78] sm:$0xff]   ;;  %v1775_v30 = vld [vmem:[%s2288_s0 + $0x108] sm:$0xff]  }
   0xb   :  { %1516 = vmatpush3.bf16.msra.mxu0 %v1756_v11  ;;  %1562 = vmatpush3.bf16.msra.mxu1 %v1757_v12  ;;  %v1776_v31 = vld [vmem:[%s2288_s0 + $0x38] sm:$0xff]   ;;  %v1777_v32 = vld [vmem:[%s2288_s0 + $0xc8] sm:$0xff]   ;;  %v1954_v33 = vld [vmem:[%s2289_s1 + $0x4] ss:$12 sps:$4 sm:$0xff]  }
   0xc   :  { %1517 = vmatprep.subr.bf16.mxu0 %v1758_v13  ;;  %1563 = vmatprep.subr.bf16.mxu1 %v1759_v14  ;;  %v1959_v34 = vld [vmem:[%s2289_s1] ss:$12 sps:$4 sm:$0xff]   ;;  %v1983_v40 = vld [vmem:[%s2289_s1 + $0x1c] ss:$12 sps:$4 sm:$0xff]   ;;  %v1988_v41 = vld [vmem:[%s2289_s1 + $0x18] ss:$12 sps:$4 sm:$0xff]  }
   0xd   :  { %280 = vmatprep.mubr.bf16.mxu0 %v1954_v33  ;;  %555 = vmatprep.mubr.bf16.mxu1 %v1954_v33  ;;  %v1781_v35 = vld [vmem:[%s2288_s0 + $0x160] sm:$0xff]   ;;  %v1784_v38 = vld [vmem:[%s2288_s0 + $0x168] sm:$0xff]   ;;  %v1789_v42 = vld [vmem:[%s2288_s0 + $0x170] sm:$0xff]  }
   0xe   :  { %v1782_v36 = vld [vmem:[%s2288_s0 + $0x120] sm:$0xff]   ;;  %v1785_v39 = vld [vmem:[%s2288_s0 + $0x128] sm:$0xff]   ;;  %v1790_v43 = vld [vmem:[%s2288_s0 + $0x130] sm:$0xff]  }
   0xf   :  { %1518 = vmatpush3.bf16.msra.mxu0 %v1760_v15  ;;  %1564 = vmatpush3.bf16.msra.mxu1 %v1761_v16  ;;  %v1783_v37 = vld [vmem:[%s2288_s0 + $0x80] sm:$0xff]   ;;  %v1791_v44 = vld [vmem:[%s2288_s0 + $0x178] sm:$0xff]   ;;  %v1798_v49 = vld [vmem:[%s2288_s0 + $0x88] sm:$0xff]  }
  0x10   :  { %1519 = vmatprep.subr.bf16.mxu0 %v1762_v17  ;;  %1565 = vmatprep.subr.bf16.mxu1 %v1763_v18  ;;  %v1792_v45 = vld [vmem:[%s2288_s0 + $0x138] sm:$0xff]   ;;  %v2009_v46 = vld [vmem:[%s2289_s1 + $0x34] ss:$12 sps:$4 sm:$0xff]   ;;  %v1799_v51 = vld [vmem:[%s2288_s0 + $0x188] sm:$0xff]  }
  0x11   :  { %v2014_v47 = vld [vmem:[%s2289_s1 + $0x30] ss:$12 sps:$4 sm:$0xff]   ;;  %v1796_v48 = vld [vmem:[%s2288_s0 + $0x180] sm:$0xff]   ;;  %v2033_v52 = vld [vmem:[%s2289_s1 + $0x4c] ss:$12 sps:$4 sm:$0xff]  }
  0x12   :  { %v1797_v50 = vld [vmem:[%s2288_s0 + $0x140] sm:$0xff]   ;;  %v1800_v53 = vld [vmem:[%s2288_s0 + $0x148] sm:$0xff]   ;;  %v1804_v54 = vld [vmem:[%s2288_s0 + $0x190] sm:$0xff]  }
  0x13   :  { %1520 = vmatpush3.bf16.msra.mxu0 %v1764_v19  ;;  %1566 = vmatpush3.bf16.msra.mxu1 %v1765_v20  ;;  %v2048_v55 = vld [vmem:[%s2289_s1 + $0x48] ss:$12 sps:$4 sm:$0xff]   ;;  %v1806_v58 = vld [vmem:[%s2288_s0 + $0x198] sm:$0xff]   ;;  %v2078_v62 = vld [vmem:[%s2289_s1 + $0x20] ss:$12 sps:$4 sm:$0xff]  }
  0x14   :  { %1521 = vmatprep.subr.bf16.mxu0 %v1766_v21  ;;  %1567 = vmatprep.subr.bf16.mxu1 %v1767_v22  ;;  %v2053_v56 = vld [vmem:[%s2289_s1 + $0x8] ss:$12 sps:$4 sm:$0xff]   ;;  %v1807_v60 = vld [vmem:[%s2288_s0 + $0x158] sm:$0xff]   ;;  %v1817_v4 = vld [vmem:[%s2288_s0 + $0x200] sm:$0xff]  }
  0x15   :  { %v1805_v57 = vld [vmem:[%s2288_s0 + $0x150] sm:$0xff]   ;;  %v2086_v0 = vld [vmem:[%s2289_s1 + $0x38] ss:$12 sps:$4 sm:$0xff]   ;;  %v1820_v8 = vld [vmem:[%s2288_s0 + $0x208] sm:$0xff]  }
  0x16   :  { %v1812_v59 = vld [vmem:[%s2288_s0 + $0x110] sm:$0xff]   ;;  %v1813_v1 = vld [vmem:[%s2288_s0 + $0x1f8] sm:$0xff]   ;;  %v1824_v6 = vld [vmem:[%s2288_s0 + $0x1a0] sm:$0xff]  }
  0x17   :  { %1522 = vmatpush3.bf16.msra.mxu0 %v1768_v23  ;;  %1568 = vmatpush3.bf16.msra.mxu1 %v1769_v24  ;;  %v1810_v61 = vld [vmem:[%s2288_s0 + $0x1f0] sm:$0xff]   ;;  %v1819_v2 = vld [vmem:[%s2288_s0 + $0x118] sm:$0xff]   ;;  %v1818_v7 = vld [vmem:[%s2288_s0 + $0x1c0] sm:$0xff]  }
  0x18   :  { %1523 = vmatprep.subr.bf16.mxu0 %v1770_v25  ;;  %1569 = vmatprep.subr.bf16.mxu1 %v1771_v26  ;;  %v1811_v63 = vld [vmem:[%s2288_s0 + $0x1b0] sm:$0xff]   ;;  %v1814_v3 = vld [vmem:[%s2288_s0 + $0x1b8] sm:$0xff]   ;;  %v1821_v9 = vld [vmem:[%s2288_s0 + $0x1c8] sm:$0xff]  }
  0x19   :  { %v2109_v5 = vld [vmem:[%s2289_s1 + $0x50] ss:$12 sps:$4 sm:$0xff]   ;;  %v1227_v13 = vld [vmem:[%s2290_s2] sm:$0xff]  ;;  %v1829_v15 = vld [vmem:[%s2288_s0 + $0x1a8] sm:$0xff]  }
  0x1a   :  { %v1822_v10 = vld [vmem:[%s2288_s0 + $0x210] sm:$0xff]   ;;  %v1825_v14 = vld [vmem:[%s2288_s0 + $0x218] sm:$0xff]   ;;  %1237 = vperm.xlu0 %1744, %v1227_v13   ;;  %v1228_v19 = vld [vmem:[%s2290_s2 + $0x8] sm:$0xff] }
  0x1b   :  { %1524 = vmatpush3.bf16.msra.mxu0 %v1772_v27  ;;  %1570 = vmatpush3.bf16.msra.mxu1 %v1773_v28  ;;  %v1823_v11 = vld [vmem:[%s2288_s0 + $0x1d0] sm:$0xff]   ;;  %v1230_v16 = vld [vmem:[%s2290_s2 + $0x18] sm:$0xff]  ;;  %v1827_v20 = vld [vmem:[%s2288_s0 + $0x220] sm:$0xff]  }
  0x1c   :  { %1525 = vmatprep.subr.bf16.mxu0 %v1774_v29  ;;  %1571 = vmatprep.subr.bf16.mxu1 %v1775_v30  ;;  %v1229_v12 = vld [vmem:[%s2290_s2 + $0x10] sm:$0xff]  ;;  %v1826_v17 = vld [vmem:[%s2288_s0 + $0x1d8] sm:$0xff]   ;;  %v1232_v21 = vld [vmem:[%s2290_s2 + $0x28] sm:$0xff] }
  0x1d   :  { %1247 = vperm.xlu1 %1745, %v1229_v12   ;;  %v1832_v18 = vld [vmem:[%s2288_s0 + $0x230] sm:$0xff]   ;;  %v1828_v22 = vld [vmem:[%s2288_s0 + $0x1e0] sm:$0xff]   ;;  %v1830_v23 = vld [vmem:[%s2288_s0 + $0x228] sm:$0xff]  }
  0x1e   :  { %1242 = vperm.xlu0 %1744, %v1228_v19   ;;  %v1231_v24 = vld [vmem:[%s2290_s2 + $0x20] sm:$0xff]  ;;  %v1234_v25 = vld [vmem:[%s2290_s2 + $0x38] sm:$0xff]  ;;  %v1831_v26 = vld [vmem:[%s2288_s0 + $0x1e8] sm:$0xff]  }
  0x1f   :  { %1526 = vmatpush3.bf16.msra.mxu0 %v1776_v31  ;;  %1572 = vmatpush3.bf16.msra.mxu1 %v1777_v32  ;;  %v1233_v27 = vld [vmem:[%s2290_s2 + $0x30] sm:$0xff]  ;;  %v1833_v28 = vld [vmem:[%s2288_s0 + $0x238] sm:$0xff]  }
  0x20   :  { %1603 = vmatprep.subr.bf16.mxu1 %v1781_v35  ;;  %1695 = vmatprep.subr.bf16.mxu0 %v1783_v37 }
  0x21   :  { %1252 = vperm.xlu1 %1745, %v1230_v16  }
  0x22   :  { %281 = vmatmul.mubr.bf16.vlgmr.msra.gmra.mrb[0].mxu0 %v1959_v34  ;;  %556 = vmatmul.mubr.bf16.vlgmr.msra.gmra.mrb[0].mxu1 %v1959_v34 }
  0x23   :  { %1604 = vmatpush3.bf16.msra.mxu1 %v1782_v36  ;;  %1696 = vmatpush3.bf16.msra.mxu0 %v1783_v37 }
  0x24   :  { %1605 = vmatprep.subr.bf16.mxu1 %v1784_v38  ;;  %288 = vmatprep.mubr.bf16.mxu0 %v1983_v40 }
  0x25   :  { %563 = vmatprep.mubr.bf16.mxu1 %v1983_v40  ;;  %1697 = vmatprep.subr.bf16.mxu0 %v1798_v49 }
  0x26   :  { %1262 = vperm.xlu1 %1745, %v1232_v21   ;;  %1257 = vperm.xlu0 %1744, %v1231_v24  }
  0x27   :  { %1606 = vmatpush3.bf16.msra.mxu1 %v1785_v39  ;;  %1698 = vmatpush3.bf16.msra.mxu0 %v1798_v49 }
  0x28   :  { %1607 = vmatprep.subr.bf16.mxu1 %v1789_v42  ;;  %1707 = vmatprep.subr.bf16.mxu0 %v1812_v59 }
  0x2a   :  { %289 = vmatmul.mubr.bf16.gmra.mrb[4].mxu0 %v1988_v41  ;;  %564 = vmatmul.mubr.bf16.gmra.mrb[4].mxu1 %v1988_v41 }
  0x2b   :  { %1608 = vmatpush3.bf16.msra.mxu1 %v1790_v43  ;;  %296 = vmatprep.mubr.bf16.mxu0 %v2009_v46 }
  0x2c   :  { %1609 = vmatprep.subr.bf16.mxu1 %v1791_v44  ;;  %571 = vmatprep.mubr.bf16.mxu1 %v2009_v46 }
  0x2d   :  { %1272 = vperm.xlu1 %1745, %v1234_v25   ;;  %1267 = vperm.xlu0 %1744, %v1233_v27  }
  0x2f   :  { %1610 = vmatpush3.bf16.msra.mxu1 %v1792_v45 }
  0x30   :  { %1611 = vmatprep.subr.bf16.mxu1 %v1796_v48 }
  0x32   :  { %297 = vmatmul.mubr.bf16.gmra.mrb[8].mxu0 %v2014_v47  ;;  %572 = vmatmul.mubr.bf16.gmra.mrb[8].mxu1 %v2014_v47 }
  0x33   :  { %304 = vmatprep.mubr.bf16.mxu0 %v2033_v52  ;;  %1612 = vmatpush3.bf16.msra.mxu1 %v1797_v50 }
  0x34   :  { %579 = vmatprep.mubr.bf16.mxu1 %v2033_v52  ;;  %1613 = vmatprep.subr.bf16.mxu1 %v1799_v51 }
  0x37   :  { %1614 = vmatpush3.bf16.msra.mxu1 %v1800_v53 }
  0x38   :  { %1615 = vmatprep.subr.bf16.mxu1 %v1804_v54 }
  0x3a   :  { %305 = vmatmul.mubr.bf16.gmra.mrb[12].mxu0 %v2048_v55  ;;  %580 = vmatmul.mubr.bf16.gmra.mrb[12].mxu1 %v2048_v55 }
  0x3b   :  { %1699 = vmatprep.mubr.msk.bf16.mxu0 %vm235_vm0, %v2053_v56  ;;  %1616 = vmatpush3.bf16.msra.mxu1 %v1805_v57 }
  0x3c   :  { %838 = vmatprep.mubr.bf16.mxu1 %v1954_v33  ;;  %1617 = vmatprep.subr.bf16.mxu1 %v1806_v58 }
  0x3f   :  { %1618 = vmatpush3.bf16.msra.mxu1 %v1807_v60 }
  0x40   :  { %1649 = vmatprep.subr.bf16.mxu1 %v1810_v61 }
  0x42   :  { %1700 = vmatmul.mubr.msk.bf16.vlgmr.msra.gmra.mrb[16].mxu0 %vm235_vm0, %v2078_v62  ;;  %839 = vmatmul.mubr.bf16.vlgmr.msra.gmra.mrb[16].mxu1 %v1959_v34 }
  0x43   :  { %1708 = vmatpush3.bf16.msra.mxu0 %v1812_v59  ;;  %1650 = vmatpush3.bf16.msra.mxu1 %v1811_v63 }
  0x44   :  { %1703 = vmatprep.mubr.msk.bf16.mxu0 %vm235_vm0, %v2086_v0  ;;  %1651 = vmatprep.subr.bf16.mxu1 %v1813_v1 }
  0x45   :  { %846 = vmatprep.mubr.bf16.mxu1 %v1983_v40  ;;  %1709 = vmatprep.subr.bf16.mxu0 %v1819_v2 }
  0x47   :  { %1710 = vmatpush3.bf16.msra.mxu0 %v1819_v2  ;;  %1652 = vmatpush3.bf16.msra.mxu1 %v1814_v3 }
  0x48   :  { %1653 = vmatprep.subr.bf16.mxu1 %v1817_v4  ;;  %1719 = vmatprep.subr.bf16.mxu0 %v1824_v6 }
  0x4a   :  { %1704 = vmatmul.mubr.msk.bf16.gmra.mrb[20].mxu0 %vm235_vm0, %v2109_v5  ;;  %847 = vmatmul.mubr.bf16.gmra.mrb[20].mxu1 %v1988_v41 }
  0x4b   :  { %1711 = vmatprep.mubr.msk.bf16.mxu0 %vm235_vm0, %v2053_v56  ;;  %1654 = vmatpush3.bf16.msra.mxu1 %v1818_v7 }
  0x4c   :  { %854 = vmatprep.mubr.bf16.mxu1 %v2009_v46  ;;  %1655 = vmatprep.subr.bf16.mxu1 %v1820_v8 }
  0x4f   :  { %1656 = vmatpush3.bf16.msra.mxu1 %v1821_v9 }
  0x50   :  { %1657 = vmatprep.subr.bf16.mxu1 %v1822_v10 }
  0x52   :  { %1712 = vmatmul.mubr.msk.bf16.vlgmr.msra.gmra.mrb[24].mxu0 %vm235_vm0, %v2078_v62  ;;  %855 = vmatmul.mubr.bf16.gmra.mrb[24].mxu1 %v2014_v47 }
  0x53   :  { %1720 = vmatpush3.bf16.msra.mxu0 %v1824_v6  ;;  %1658 = vmatpush3.bf16.msra.mxu1 %v1823_v11 }
  0x54   :  { %1715 = vmatprep.mubr.msk.bf16.mxu0 %vm235_vm0, %v2086_v0  ;;  %1659 = vmatprep.subr.bf16.mxu1 %v1825_v14 }
  0x55   :  { %862 = vmatprep.mubr.bf16.mxu1 %v2033_v52  ;;  %1721 = vmatprep.subr.bf16.mxu0 %v1829_v15 }
  0x57   :  { %1722 = vmatpush3.bf16.msra.mxu0 %v1829_v15  ;;  %1660 = vmatpush3.bf16.msra.mxu1 %v1826_v17 }
  0x58   :  { %1731 = vmatprep.subr.bf16.mxu0 %v1832_v18  ;;  %1661 = vmatprep.subr.bf16.mxu1 %v1827_v20 }
  0x5a   :  { %1716 = vmatmul.mubr.msk.bf16.gmra.mrb[28].mxu0 %vm235_vm0, %v2109_v5  ;;  %863 = vmatmul.mubr.bf16.gmra.mrb[28].mxu1 %v2048_v55 }
  0x5b   :  { %1723 = vmatprep.mubr.msk.bf16.mxu0 %vm235_vm0, %v2053_v56  ;;  %1662 = vmatpush3.bf16.msra.mxu1 %v1828_v22 }
  0x5c   :  { %1121 = vmatprep.mubr.bf16.mxu1 %v1954_v33  ;;  %1663 = vmatprep.subr.bf16.mxu1 %v1830_v23 }
  0x5f   :  { %1664 = vmatpush3.bf16.msra.mxu1 %v1831_v26 }
  0x62   :  { %1724 = vmatmul.mubr.msk.bf16.vlgmr.msra.gmra.mrb[32].mxu0 %vm235_vm0, %v2078_v62  ;;  %1122 = vmatmul.mubr.bf16.vlgmr.msra.gmra.mrb[32].mxu1 %v1959_v34 }
  0x63   :  { %1732 = vmatpush3.bf16.msra.mxu0 %v1832_v18  ;;  %1727 = vmatprep.mubr.msk.bf16.mxu0 %vm235_vm0, %v2086_v0 }
  0x64   :  { %1129 = vmatprep.mubr.bf16.mxu1 %v1983_v40  ;;  %1733 = vmatprep.subr.bf16.mxu0 %v1833_v28 }
  0x67   :  { %1734 = vmatpush3.bf16.msra.mxu0 %v1833_v28 }
  0x6a   :  { %1728 = vmatmul.mubr.msk.bf16.gmra.mrb[36].mxu0 %vm235_vm0, %v2109_v5  ;;  %1130 = vmatmul.mubr.bf16.gmra.mrb[36].mxu1 %v1988_v41 }
  0x6b   :  { %1735 = vmatprep.mubr.msk.bf16.mxu0 %vm235_vm0, %v2053_v56  ;;  %1137 = vmatprep.mubr.bf16.mxu1 %v2009_v46 }
  0x72   :  { %1736 = vmatmul.mubr.msk.bf16.vlgmr.msra.gmra.mrb[40].mxu0 %vm235_vm0, %v2078_v62  ;;  %1138 = vmatmul.mubr.bf16.gmra.mrb[40].mxu1 %v2014_v47 }
  0x73   :  { %1739 = vmatprep.mubr.msk.bf16.mxu0 %vm235_vm0, %v2086_v0  ;;  %1145 = vmatprep.mubr.bf16.mxu1 %v2033_v52 }
  0x7a   :  { %1740 = vmatmul.mubr.msk.bf16.gmra.mrb[44].mxu0 %vm235_vm0, %v2109_v5  ;;  %1146 = vmatmul.mubr.bf16.gmra.mrb[44].mxu1 %v2048_v55 }
  0xf5   :  { %v1527_v29 = vpop.f32.mrb[0].mxu0  ;;  %v1573_v30 = vpop.f32.mrb[0].mxu1 }
  0xf6   :  { %v1528_v31 = vpop.f32.mrb[1].mxu0  ;;  %v1574_v33 = vpop.f32.mrb[1].mxu1 }
  0xf7   :  { %v1529_v32 = vadd.f32 %v1528_v31, %v1527_v29  ;;  %v1530_v34 = vpop.f32.mrb[2].mxu0  ;;  %v2219_v35 = vadd.f32 %v1574_v33, %v1573_v30  ;;  %v1576_v36 = vpop.f32.mrb[2].mxu1 }
  0xf8   :  { %v1531_v37 = vpop.f32.mrb[3].mxu0  ;;  %v1577_v39 = vpop.f32.mrb[3].mxu1 }
  0xf9   :  { %v1532_v38 = vadd.f32 %v1531_v37, %v1530_v34  ;;  %v2221_v40 = vadd.f32 %v1577_v39, %v1576_v36 }
  0xfd   :  { %v1533_v41 = vpop.f32.mrb[4].mxu0  ;;  %v1579_v42 = vpop.f32.mrb[4].mxu1 }
  0xfe   :  { %v1534_v43 = vpop.f32.mrb[5].mxu0  ;;  %v1580_v45 = vpop.f32.mrb[5].mxu1 }
  0xff   :  { %v1535_v44 = vadd.f32 %v1534_v43, %v1533_v41  ;;  %v1536_v46 = vpop.f32.mrb[6].mxu0  ;;  %v1581_v47 = vadd.f32 %v1580_v45, %v1579_v42  ;;  %v1582_v48 = vpop.f32.mrb[6].mxu1 }
 0x100   :  { %v1537_v49 = vpop.f32.mrb[7].mxu0  ;;  %v1583_v51 = vpop.f32.mrb[7].mxu1 }
 0x101   :  { %v1538_v50 = vadd.f32 %v1537_v49, %v1536_v46  ;;  %v1584_v52 = vadd.f32 %v1583_v51, %v1582_v48 }
 0x105   :  { %v1539_v53 = vpop.f32.mrb[8].mxu0  ;;  %v1585_v54 = vpop.f32.mrb[8].mxu1 }
 0x106   :  { %v1540_v55 = vpop.f32.mrb[9].mxu0  ;;  %v1586_v57 = vpop.f32.mrb[9].mxu1 }
 0x107   :  { %v1541_v56 = vadd.f32 %v1540_v55, %v1539_v53  ;;  %v1542_v58 = vpop.f32.mrb[10].mxu0  ;;  %v2223_v59 = vadd.f32 %v1586_v57, %v1585_v54  ;;  %v1588_v60 = vpop.f32.mrb[10].mxu1 }
 0x108   :  { %v1543_v61 = vpop.f32.mrb[11].mxu0  ;;  %v1589_v63 = vpop.f32.mrb[11].mxu1 }
 0x109   :  { %v1544_v62 = vadd.f32 %v1543_v61, %v1542_v58  ;;  %v2225_v0 = vadd.f32 %v1589_v63, %v1588_v60 }
 0x10d   :  { %v1545_v1 = vpop.f32.mrb[12].mxu0  ;;  %v1591_v2 = vpop.f32.mrb[12].mxu1 }
 0x10e   :  { %v1546_v3 = vpop.f32.mrb[13].mxu0  ;;  %v1592_v5 = vpop.f32.mrb[13].mxu1 }
 0x10f   :  { %v1547_v4 = vadd.f32 %v1546_v3, %v1545_v1  ;;  %v1548_v6 = vpop.f32.mrb[14].mxu0  ;;  %v1593_v7 = vadd.f32 %v1592_v5, %v1591_v2  ;;  %v1594_v8 = vpop.f32.mrb[14].mxu1 }
 0x110   :  { %v1549_v9 = vpop.f32.mrb[15].mxu0  ;;  %v1595_v11 = vpop.f32.mrb[15].mxu1 }
 0x111   :  { %v1550_v10 = vadd.f32 %v1549_v9, %v1548_v6  ;;  %v1596_v12 = vadd.f32 %v1595_v11, %v1594_v8 }
 0x115   :  { %v1701_v13 = vpop.f32.mrb[16].mxu0  ;;  %v1619_v15 = vpop.f32.mrb[16].mxu1 }
 0x116   :  { %v2227_v14 = vadd.f32 %v1701_v13, %v1535_v44  ;;  %v347_v16 = vpop.f32.mrb[17].mxu0  ;;  %v1620_v18 = vpop.f32.mrb[17].mxu1 }
 0x117   :  { %v2229_v17 = vadd.f32 %v1529_v32, %v347_v16  ;;  %v1702_v19 = vpop.f32.mrb[18].mxu0  ;;  %v1621_v20 = vadd.f32 %v1620_v18, %v1619_v15  ;;  %v1622_v22 = vpop.f32.mrb[18].mxu1 }
 0x118   :  { %v2231_v21 = vadd.f32 %v1702_v19, %v1538_v50  ;;  %v350_v23 = vpop.f32.mrb[19].mxu0  ;;  %v1623_v25 = vpop.f32.mrb[19].mxu1 }
 0x119   :  { %v2233_v24 = vadd.f32 %v1532_v38, %v350_v23  ;;  %v2235_v26 = vadd.f32 %v1623_v25, %v1622_v22 }
 0x11d   :  { %v1705_v27 = vpop.f32.mrb[20].mxu0  ;;  %v1625_v29 = vpop.f32.mrb[20].mxu1 }
 0x11e   :  { %v2237_v28 = vadd.f32 %v1705_v27, %v1547_v4  ;;  %v363_v30 = vpop.f32.mrb[21].mxu0  ;;  %v1626_v32 = vpop.f32.mrb[21].mxu1 }
 0x11f   :  { %v2239_v31 = vadd.f32 %v1541_v56, %v363_v30  ;;  %v1706_v33 = vpop.f32.mrb[22].mxu0  ;;  %v1627_v34 = vadd.f32 %v1626_v32, %v1625_v29  ;;  %v1628_v37 = vpop.f32.mrb[22].mxu1 }
 0x120   :  { %v2241_v36 = vadd.f32 %v1706_v33, %v1550_v10  ;;  %v366_v39 = vpop.f32.mrb[23].mxu0  ;;  %v1629_v38 = vpop.f32.mrb[23].mxu1 }
 0x121   :  { %v2243_v41 = vadd.f32 %v1544_v62, %v366_v39  ;;  %v1630_v42 = vadd.f32 %v1629_v38, %v1628_v37 }
 0x125   :  { %v1713_v43 = vpop.f32.mrb[24].mxu0  ;;  %v1631_v45 = vpop.f32.mrb[24].mxu1 }
 0x126   :  { %v631_v44 = vadd.f32 %v1713_v43, %v1581_v47  ;;  %v622_v46 = vpop.f32.mrb[25].mxu0  ;;  %v1632_v49 = vpop.f32.mrb[25].mxu1 }
 0x127   :  { %v623_v48 = vadd.f32 %v2219_v35, %v622_v46  ;;  %v1714_v50 = vpop.f32.mrb[26].mxu0  ;;  %v1633_v53 = vadd.f32 %v1632_v49, %v1631_v45  ;;  %v1634_v55 = vpop.f32.mrb[26].mxu1 }
 0x128   :  { %v655_v51 = vmax.f32 %v2227_v14, %v631_v44  ;;  %v634_v54 = vadd.f32 %v1714_v50, %v1584_v52  ;;  %v625_v56 = vpop.f32.mrb[27].mxu0  ;;  %v1635_v60 = vpop.f32.mrb[27].mxu1 }
 0x129   :  { %v653_v57 = vmax.f32 %v2229_v17, %v623_v48  ;;  %v626_v58 = vadd.f32 %v2221_v40, %v625_v56  ;;  %v1636_v47 = vadd.f32 %v1635_v60, %v1634_v55  ;;  %v1248_v55 = vpop.permute.xlu1 %1247 }
 0x12a   :  { %v656_v61 = vmax.f32 %v2231_v21, %v634_v54 }
 0x12b   :  { %v654_v62 = vmax.f32 %v2233_v24, %v626_v58 }
 0x12d   :  { %v1717_v63 = vpop.f32.mrb[28].mxu0  ;;  %v1637_v1 = vpop.f32.mrb[28].mxu1 }
 0x12e   :  { %v647_v35 = vadd.f32 %v1717_v63, %v1593_v7  ;;  %v638_v2 = vpop.f32.mrb[29].mxu0  ;;  %v1638_v4 = vpop.f32.mrb[29].mxu1 }
 0x12f   :  { %v639_v3 = vadd.f32 %v2223_v59, %v638_v2  ;;  %v1718_v52 = vpop.f32.mrb[30].mxu0  ;;  %v1639_v6 = vadd.f32 %v1638_v4, %v1637_v1  ;;  %v1640_v9 = vpop.f32.mrb[30].mxu1 }
 0x130   :  { %v659_v5 = vmax.f32 %v2237_v28, %v647_v35  ;;  %v650_v8 = vadd.f32 %v1718_v52, %v1596_v12  ;;  %v641_v40 = vpop.f32.mrb[31].mxu0  ;;  %v1641_v13 = vpop.f32.mrb[31].mxu1 }
 0x131   :  { %v657_v10 = vmax.f32 %v2239_v31, %v639_v3  ;;  %v642_v11 = vadd.f32 %v2225_v0, %v641_v40  ;;  %v1642_v7 = vadd.f32 %v1641_v13, %v1640_v9  ;;  %v1253_v40 = vpop.permute.xlu1 %1252 }
 0x132   :  { %v660_v14 = vmax.f32 %v2241_v36, %v650_v8  ;;  %v1238_v36 = vpop.permute.xlu0 %1237 }
 0x133   :  { %v658_v15 = vmax.f32 %v2243_v41, %v642_v11 }
 0x135   :  { %v1725_v16 = vpop.f32.mrb[32].mxu0  ;;  %v1665_v17 = vpop.f32.mrb[32].mxu1 }
 0x136   :  { %v914_v59 = vadd.f32 %v1725_v16, %v1627_v34  ;;  %v905_v18 = vpop.f32.mrb[33].mxu0  ;;  %v1666_v21 = vpop.f32.mrb[33].mxu1 }
 0x137   :  { %v906_v19 = vadd.f32 %v1621_v20, %v905_v18  ;;  %v1726_v22 = vpop.f32.mrb[34].mxu0  ;;  %v1667_v23 = vadd.f32 %v1666_v21, %v1665_v17  ;;  %v1668_v25 = vpop.f32.mrb[34].mxu1 }
 0x138   :  { %v938_v12 = vmax.f32 %v655_v51, %v914_v59  ;;  %v917_v24 = vadd.f32 %v1726_v22, %v1630_v42  ;;  %v908_v27 = vpop.f32.mrb[35].mxu0  ;;  %v1669_v29 = vpop.f32.mrb[35].mxu1 }
 0x139   :  { %v936_v28 = vmax.f32 %v653_v57, %v906_v19  ;;  %v909_v0 = vadd.f32 %v2235_v26, %v908_v27  ;;  %v1670_v31 = vadd.f32 %v1669_v29, %v1668_v25  ;;  %v1243_v56 = vpop.permute.xlu0 %1242 }
 0x13a   :  { %v939_v30 = vmax.f32 %v656_v61, %v917_v24 }
 0x13b   :  { %v937_v32 = vmax.f32 %v654_v62, %v909_v0 }
 0x13d   :  { %v1729_v33 = vpop.f32.mrb[36].mxu0  ;;  %v1671_v37 = vpop.f32.mrb[36].mxu1 }
 0x13e   :  { %v930_v34 = vadd.f32 %v1729_v33, %v1639_v6  ;;  %v921_v39 = vpop.f32.mrb[37].mxu0  ;;  %v1672_v41 = vpop.f32.mrb[37].mxu1 }
 0x13f   :  { %v922_v20 = vadd.f32 %v1633_v53, %v921_v39  ;;  %v1730_v38 = vpop.f32.mrb[38].mxu0  ;;  %v1673_v42 = vadd.f32 %v1672_v41, %v1671_v37  ;;  %v1674_v45 = vpop.f32.mrb[38].mxu1 }
 0x140   :  { %v2258_v43 = vmax.f32 %v659_v5, %v930_v34  ;;  %v933_v44 = vadd.f32 %v1730_v38, %v1642_v7  ;;  %v924_v46 = vpop.f32.mrb[39].mxu0  ;;  %v1675_v49 = vpop.f32.mrb[39].mxu1 }
 0x141   :  { %v940_v48 = vmax.f32 %v657_v10, %v922_v20  ;;  %v925_v26 = vadd.f32 %v1636_v47, %v924_v46  ;;  %v1676_v51 = vadd.f32 %v1675_v49, %v1674_v45 }
 0x142   :  { %v2260_v50 = vmax.f32 %v660_v14, %v933_v44 }
 0x143   :  { %v941_v54 = vmax.f32 %v658_v15, %v925_v26  ;;  %v1258_v15 = vpop.permute.xlu0 %1257 }
 0x145   :  { %v1737_v57 = vpop.f32.mrb[40].mxu0  ;;  %v1677_v58 = vpop.f32.mrb[40].mxu1 }
 0x146   :  { %v1197_v53 = vadd.f32 %v1737_v57, %v1673_v42  ;;  %v1188_v60 = vpop.f32.mrb[41].mxu0  ;;  %v1678_v61 = vpop.f32.mrb[41].mxu1 }
 0x147   :  { %v1189_v62 = vadd.f32 %v1667_v23, %v1188_v60  ;;  %v1738_v63 = vpop.f32.mrb[42].mxu0  ;;  %v1679_v1 = vadd.f32 %v1678_v61, %v1677_v58  ;;  %v1680_v2 = vpop.f32.mrb[42].mxu1 }
 0x148   :  { %v1221_v35 = vmax.f32 %v938_v12, %v1197_v53  ;;  %v1200_v3 = vadd.f32 %v1738_v63, %v1676_v51  ;;  %v1191_v4 = vpop.f32.mrb[43].mxu0  ;;  %v1681_v52 = vpop.f32.mrb[43].mxu1 }
 0x149   :  { %v1219_v47 = vmax.f32 %v936_v28, %v1189_v62  ;;  %v1192_v5 = vadd.f32 %v1670_v31, %v1191_v4  ;;  %v1682_v9 = vadd.f32 %v1681_v52, %v1680_v2  ;;  %v1263_v28 = vpop.permute.xlu1 %1262  ;;  %v1268_v39 = vpop.permute.xlu0 %1267 }
 0x14a   :  { %v1277_v6 = vadd.f32 %v1248_v55, %v1221_v35  ;;  %v1222_v8 = vmax.f32 %v939_v30, %v1200_v3 }
 0x14b   :  { %v1275_v10 = vadd.f32 %v1238_v36, %v1219_v47  ;;  %v1220_v11 = vmax.f32 %v937_v32, %v1192_v5 }
 0x14c   :  { %v1285_v13 = vmax.f32 %v1277_v6, 0.0  ;;  %v1278_v14 = vadd.f32 %v1253_v40, %v1222_v8 }
 0x14d   :  { %v1283_v7 = vmax.f32 %v1275_v10, 0.0  ;;  %v1276_v16 = vadd.f32 %v1243_v56, %v1220_v11  ;;  %v1741_v59 = vpop.f32.mrb[44].mxu0  ;;  %v1683_v18 = vpop.f32.mrb[44].mxu1 }
 0x14e   :  { %1293 = vst [vmem:[%s2291_s3 + $0x10] sm:$0xff] %v1285_v13  ;;  %v1286_v17 = vmax.f32 %v1278_v14, 0.0  ;;  %v1204_v19 = vpop.f32.mrb[45].mxu0  ;;  %v1684_v22 = vpop.f32.mrb[45].mxu1 }
 0x14f   :  { %1291 = vst [vmem:[%s2291_s3] sm:$0xff] %v1283_v7  ;;  %v1284_v21 = vmax.f32 %v1276_v16, 0.0  ;;  %v1205_v12 = vadd.f32 %v1679_v1, %v1204_v19  ;;  %v1742_v23 = vpop.f32.mrb[46].mxu0  ;;  %v1685_v24 = vadd.f32 %v1684_v22, %v1683_v18  ;;  %v1686_v25 = vpop.f32.mrb[46].mxu1 }
 0x150   :  { %1294 = vst [vmem:[%s2291_s3 + $0x18] sm:$0xff] %v1286_v17  ;;  %v1207_v27 = vpop.f32.mrb[47].mxu0  ;;  %v1687_v29 = vpop.f32.mrb[47].mxu1 }
 0x151   :  { %1292 = vst [vmem:[%s2291_s3 + $0x8] sm:$0xff] %v1284_v21  ;;  %v1223_v0 = vmax.f32 %v940_v48, %v1205_v12  ;;  %v1208_v30 = vadd.f32 %v1682_v9, %v1207_v27  ;;  %v1213_v31 = vadd.f32 %v1741_v59, %v1685_v24  ;;  %v1688_v32 = vadd.f32 %v1687_v29, %v1686_v25  ;;  %v1273_v44 = vpop.permute.xlu1 %1272 }
 0x153   :  { %v1279_v33 = vadd.f32 %v1258_v15, %v1223_v0  ;;  %v1224_v36 = vmax.f32 %v941_v54, %v1208_v30  ;;  %v1225_v34 = vmax.f32 %v2258_v43, %v1213_v31  ;;  %v1216_v37 = vadd.f32 %v1742_v23, %v1688_v32 }
 0x155   :  { %v1287_v20 = vmax.f32 %v1279_v33, 0.0  ;;  %v1280_v41 = vadd.f32 %v1263_v28, %v1224_v36  ;;  %v1281_v38 = vadd.f32 %v1268_v39, %v1225_v34  ;;  %v1226_v42 = vmax.f32 %v2260_v50, %v1216_v37 }
 0x157   :  { %1295 = vst [vmem:[%s2291_s3 + $0x20] sm:$0xff] %v1287_v20  ;;  %v1288_v45 = vmax.f32 %v1280_v41, 0.0  ;;  %v1289_v46 = vmax.f32 %v1281_v38, 0.0  ;;  %v1282_v48 = vadd.f32 %v1273_v44, %v1226_v42 }
 0x159   :  { %1296 = vst [vmem:[%s2291_s3 + $0x28] sm:$0xff] %v1288_v45  ;;  %1297 = vst [vmem:[%s2291_s3 + $0x30] sm:$0xff] %v1289_v46  ;;  %v1290_v43 = vmax.f32 %v1282_v48, 0.0 }
 0x15b   :  { %1298 = vst [vmem:[%s2291_s3 + $0x38] sm:$0xff] %v1290_v43 }

// kernel: cnn_femnist_forward.5
= control target key start
LH: loop header
LB: loop body
LE: loop exit
PB: predicated region body
PF: predicated region fallthrough
CT: control target
= control target key end

     0   :  { %vm2948_vm0 = vmmov 0   ;;  %vm1690_vm1 = vcmask 523264   ;;  %vm2214_vm2 = vcmask 506880   ;;  %s3602_s1 = inlined_call_operand.vmem [shape: bf16[3136,62], index: 1, kind: input, shape index: {}]   ;;  %s3603_s0 = inlined_call_operand.vmem [shape: bf16[8,3136], index: 0, kind: input, shape index: {}]   ;;  %s3604_s2 = inlined_call_operand.vmem [shape: f32[1,62], index: 2, kind: input, shape index: {}]   ;;  %s3605_s3 = inlined_call_operand.vmem [shape: f32[8,62], index: 3, kind: output, shape index: {}]  }
   0x1   :  { %v2726_v0 = vld [vmem:[%s3602_s1 + $0x40] sm:$0xff]   ;;  %v2730_v4 = vld [vmem:[%s3602_s1 + $0x48] sm:$0xff]   ;;  %v2734_v8 = vld [vmem:[%s3602_s1 + $0x50] sm:$0xff]  }
   0x2   :  { %v2727_v1 = vld [vmem:[%s3602_s1] sm:$0xff]   ;;  %2443 = vmatprep.subr.bf16.mxu0 %v2726_v0  ;;  %v2731_v5 = vld [vmem:[%s3602_s1 + $0x8] sm:$0xff]   ;;  %v2735_v9 = vld [vmem:[%s3602_s1 + $0x10] sm:$0xff]  }
   0x3   :  { %v2728_v2 = vld [vmem:[%s3602_s1 + $0xc0] sm:$0xff]   ;;  %2444 = vmatpush3.bf16.msra.mxu0 %v2727_v1  ;;  %v2732_v6 = vld [vmem:[%s3602_s1 + $0xc8] sm:$0xff]   ;;  %v2736_v10 = vld [vmem:[%s3602_s1 + $0xd0] sm:$0xff]  }
   0x4   :  { %v2729_v3 = vld [vmem:[%s3602_s1 + $0x80] sm:$0xff]   ;;  %2465 = vmatprep.subr.bf16.mxu1 %v2728_v2  ;;  %2445 = vmatprep.subr.bf16.mxu0 %v2730_v4  ;;  %v2733_v7 = vld [vmem:[%s3602_s1 + $0x88] sm:$0xff]   ;;  %v2737_v11 = vld [vmem:[%s3602_s1 + $0x90] sm:$0xff]  }
   0x5   :  { %2466 = vmatpush3.bf16.msra.mxu1 %v2729_v3  ;;  %v2738_v12 = vld [vmem:[%s3602_s1 + $0x58] sm:$0xff]   ;;  %v2742_v16 = vld [vmem:[%s3602_s1 + $0x60] sm:$0xff]   ;;  %v2746_v20 = vld [vmem:[%s3602_s1 + $0x68] sm:$0xff]  }
   0x6   :  { %2467 = vmatprep.subr.bf16.mxu1 %v2732_v6  ;;  %v2739_v13 = vld [vmem:[%s3602_s1 + $0x18] sm:$0xff]   ;;  %v2743_v17 = vld [vmem:[%s3602_s1 + $0x20] sm:$0xff]   ;;  %v2747_v21 = vld [vmem:[%s3602_s1 + $0x28] sm:$0xff]  }
   0x7   :  { %2446 = vmatpush3.bf16.msra.mxu0 %v2731_v5  ;;  %v2740_v14 = vld [vmem:[%s3602_s1 + $0xd8] sm:$0xff]   ;;  %v2744_v18 = vld [vmem:[%s3602_s1 + $0xe0] sm:$0xff]   ;;  %v2748_v22 = vld [vmem:[%s3602_s1 + $0xe8] sm:$0xff]  }
   0x8   :  { %2447 = vmatprep.subr.bf16.mxu0 %v2734_v8  ;;  %v2741_v15 = vld [vmem:[%s3602_s1 + $0x98] sm:$0xff]   ;;  %v2745_v19 = vld [vmem:[%s3602_s1 + $0xa0] sm:$0xff]   ;;  %v2749_v23 = vld [vmem:[%s3602_s1 + $0xa8] sm:$0xff]  }
   0x9   :  { %2468 = vmatpush3.bf16.msra.mxu1 %v2733_v7  ;;  %v2750_v24 = vld [vmem:[%s3602_s1 + $0x70] sm:$0xff]   ;;  %v2754_v28 = vld [vmem:[%s3602_s1 + $0x78] sm:$0xff]   ;;  %v15_v31 = vld [vmem:[%s3603_s0] sm:$0xff] }
   0xa   :  { %2469 = vmatprep.subr.bf16.mxu1 %v2736_v10  ;;  %v2751_v25 = vld [vmem:[%s3602_s1 + $0x30] sm:$0xff]   ;;  %v2755_v29 = vld [vmem:[%s3602_s1 + $0x38] sm:$0xff]   ;;  %v2221_v32 = vcombine.low %v15_v31, %v15_v31  ;;  %v2222_v33 = vcombine.high %v15_v31, %v15_v31  ;;  %v2760_v35 = vld [vmem:[%s3602_s1 + $0x140] sm:$0xff]  }
   0xb   :  { %2448 = vmatpush3.bf16.msra.mxu0 %v2735_v9  ;;  %v2752_v26 = vld [vmem:[%s3602_s1 + $0xf0] sm:$0xff]   ;;  %v2756_v30 = vld [vmem:[%s3602_s1 + $0xf8] sm:$0xff]   ;;  %v16_v36 = vld [vmem:[%s3603_s0 + $0x8] sm:$0xff] }
   0xc   :  { %2449 = vmatprep.subr.bf16.mxu0 %v2738_v12  ;;  %v2753_v27 = vld [vmem:[%s3602_s1 + $0xb0] sm:$0xff]   ;;  %v2759_v34 = vld [vmem:[%s3602_s1 + $0xb8] sm:$0xff]   ;;  %1726 = vmatprep.mubr.bf16.mxu0 %v2222_v33  ;;  %v2223_v37 = vcombine.low %v16_v36, %v16_v36  ;;  %v2224_v38 = vcombine.high %v16_v36, %v16_v36  ;;  %v2763_v39 = vld [vmem:[%s3602_s1 + $0x100] sm:$0xff]  }
   0xd   :  { %2470 = vmatpush3.bf16.msra.mxu1 %v2737_v11  ;;  %v2764_v40 = vld [vmem:[%s3602_s1 + $0x1c0] sm:$0xff]   ;;  %v2766_v42 = vld [vmem:[%s3602_s1 + $0x148] sm:$0xff]   ;;  %v2770_v46 = vld [vmem:[%s3602_s1 + $0x150] sm:$0xff]  }
   0xe   :  { %2471 = vmatprep.subr.bf16.mxu1 %v2740_v14  ;;  %1766 = vmatprep.mubr.bf16.mxu1 %v2224_v38  ;;  %v2765_v41 = vld [vmem:[%s3602_s1 + $0x180] sm:$0xff]   ;;  %v2767_v43 = vld [vmem:[%s3602_s1 + $0x108] sm:$0xff]   ;;  %v2771_v47 = vld [vmem:[%s3602_s1 + $0x110] sm:$0xff]  }
   0xf   :  { %2450 = vmatpush3.bf16.msra.mxu0 %v2739_v13  ;;  %v2768_v44 = vld [vmem:[%s3602_s1 + $0x1c8] sm:$0xff]   ;;  %v2772_v48 = vld [vmem:[%s3602_s1 + $0x1d0] sm:$0xff]   ;;  %v2774_v50 = vld [vmem:[%s3602_s1 + $0x158] sm:$0xff]  }
  0x10   :  { %2451 = vmatprep.subr.bf16.mxu0 %v2742_v16  ;;  %v2769_v45 = vld [vmem:[%s3602_s1 + $0x188] sm:$0xff]   ;;  %v2773_v49 = vld [vmem:[%s3602_s1 + $0x190] sm:$0xff]   ;;  %v2775_v51 = vld [vmem:[%s3602_s1 + $0x118] sm:$0xff]  }
  0x11   :  { %2472 = vmatpush3.bf16.msra.mxu1 %v2741_v15  ;;  %v2776_v52 = vld [vmem:[%s3602_s1 + $0x1d8] sm:$0xff]   ;;  %v2778_v54 = vld [vmem:[%s3602_s1 + $0x160] sm:$0xff]   ;;  %v2782_v58 = vld [vmem:[%s3602_s1 + $0x168] sm:$0xff]  }
  0x12   :  { %2473 = vmatprep.subr.bf16.mxu1 %v2744_v18  ;;  %v2777_v53 = vld [vmem:[%s3602_s1 + $0x198] sm:$0xff]   ;;  %v2779_v55 = vld [vmem:[%s3602_s1 + $0x120] sm:$0xff]   ;;  %v2783_v59 = vld [vmem:[%s3602_s1 + $0x128] sm:$0xff]  }
  0x13   :  { %2452 = vmatpush3.bf16.msra.mxu0 %v2743_v17  ;;  %v2780_v56 = vld [vmem:[%s3602_s1 + $0x1e0] sm:$0xff]   ;;  %v2784_v60 = vld [vmem:[%s3602_s1 + $0x1e8] sm:$0xff]   ;;  %v2786_v62 = vld [vmem:[%s3602_s1 + $0x170] sm:$0xff]  }
  0x14   :  { %2453 = vmatprep.subr.bf16.mxu0 %v2746_v20  ;;  %v2781_v57 = vld [vmem:[%s3602_s1 + $0x1a0] sm:$0xff]   ;;  %v2785_v61 = vld [vmem:[%s3602_s1 + $0x1a8] sm:$0xff]   ;;  %v2787_v63 = vld [vmem:[%s3602_s1 + $0x130] sm:$0xff]  }
  0x15   :  { %2474 = vmatpush3.bf16.msra.mxu1 %v2745_v19  ;;  %v2788_v0 = vld [vmem:[%s3602_s1 + $0x1f0] sm:$0xff]   ;;  %v2790_v2 = vld [vmem:[%s3602_s1 + $0x178] sm:$0xff]   ;;  %v2796_v9 = vld [vmem:[%s3602_s1 + $0x240] sm:$0xff]  }
  0x16   :  { %2475 = vmatprep.subr.bf16.mxu1 %v2748_v22  ;;  %v2789_v1 = vld [vmem:[%s3602_s1 + $0x1b0] sm:$0xff]   ;;  %v2791_v3 = vld [vmem:[%s3602_s1 + $0x138] sm:$0xff]   ;;  %v2799_v13 = vld [vmem:[%s3602_s1 + $0x200] sm:$0xff]  }
  0x17   :  { %2454 = vmatpush3.bf16.msra.mxu0 %v2747_v21  ;;  %v2792_v4 = vld [vmem:[%s3602_s1 + $0x1f8] sm:$0xff]   ;;  %v17_v5 = vld [vmem:[%s3603_s0 + $0x10] sm:$0xff]  ;;  %v2800_v14 = vld [vmem:[%s3602_s1 + $0x2c0] sm:$0xff]  }
  0x18   :  { %2455 = vmatprep.subr.bf16.mxu0 %v2750_v24  ;;  %v2225_v6 = vcombine.low %v17_v5, %v17_v5  ;;  %v2226_v7 = vcombine.high %v17_v5, %v17_v5  ;;  %v2795_v8 = vld [vmem:[%s3602_s1 + $0x1b8] sm:$0xff]   ;;  %v2801_v15 = vld [vmem:[%s3602_s1 + $0x280] sm:$0xff]   ;;  %v2802_v16 = vld [vmem:[%s3602_s1 + $0x248] sm:$0xff]  }
  0x19   :  { %2476 = vmatpush3.bf16.msra.mxu1 %v2749_v23  ;;  %v18_v10 = vld [vmem:[%s3603_s0 + $0x18] sm:$0xff]  ;;  %v2803_v17 = vld [vmem:[%s3602_s1 + $0x208] sm:$0xff]   ;;  %v2806_v20 = vld [vmem:[%s3602_s1 + $0x250] sm:$0xff]  }
  0x1a   :  { %2477 = vmatprep.subr.bf16.mxu1 %v2752_v26  ;;  %v2227_v11 = vcombine.low %v18_v10, %v18_v10  ;;  %v2228_v12 = vcombine.high %v18_v10, %v18_v10  ;;  %v2804_v18 = vld [vmem:[%s3602_s1 + $0x2c8] sm:$0xff]   ;;  %v2807_v21 = vld [vmem:[%s3602_s1 + $0x210] sm:$0xff]   ;;  %v2810_v24 = vld [vmem:[%s3602_s1 + $0x258] sm:$0xff]  }
  0x1b   :  { %2456 = vmatpush3.bf16.msra.mxu0 %v2751_v25  ;;  %v2805_v19 = vld [vmem:[%s3602_s1 + $0x288] sm:$0xff]   ;;  %v2808_v22 = vld [vmem:[%s3602_s1 + $0x2d0] sm:$0xff]   ;;  %v2811_v25 = vld [vmem:[%s3602_s1 + $0x218] sm:$0xff]  }
  0x1c   :  { %2457 = vmatprep.subr.bf16.mxu0 %v2754_v28  ;;  %v2809_v23 = vld [vmem:[%s3602_s1 + $0x290] sm:$0xff]   ;;  %v2812_v26 = vld [vmem:[%s3602_s1 + $0x2d8] sm:$0xff]   ;;  %v2814_v28 = vld [vmem:[%s3602_s1 + $0x260] sm:$0xff]  }
  0x1d   :  { %2478 = vmatpush3.bf16.msra.mxu1 %v2753_v27  ;;  %v2813_v27 = vld [vmem:[%s3602_s1 + $0x298] sm:$0xff]   ;;  %v2817_v31 = vld [vmem:[%s3602_s1 + $0x2a0] sm:$0xff]   ;;  %v2819_v33 = vld [vmem:[%s3602_s1 + $0x228] sm:$0xff]  }
  0x1e   :  { %2479 = vmatprep.subr.bf16.mxu1 %v2756_v30  ;;  %v2816_v30 = vld [vmem:[%s3602_s1 + $0x2e0] sm:$0xff]   ;;  %v2822_v36 = vld [vmem:[%s3602_s1 + $0x270] sm:$0xff]  }
  0x1f   :  { %2458 = vmatpush3.bf16.msra.mxu0 %v2755_v29  ;;  %v2815_v29 = vld [vmem:[%s3602_s1 + $0x220] sm:$0xff]   ;;  %v2824_v38 = vld [vmem:[%s3602_s1 + $0x2f0] sm:$0xff]  }
  0x20   :  { %2487 = vmatprep.subr.bf16.mxu0 %v2760_v35  ;;  %v2821_v35 = vld [vmem:[%s3602_s1 + $0x2a8] sm:$0xff]   ;;  %v2853_v5 = vld [vmem:[%s3602_s1 + $0x3a0] sm:$0xff]   ;;  %v2858_v10 = vld [vmem:[%s3602_s1 + $0x370] sm:$0xff]  }
  0x21   :  { %2480 = vmatpush3.bf16.msra.mxu1 %v2759_v34  ;;  %v2820_v34 = vld [vmem:[%s3602_s1 + $0x2e8] sm:$0xff]  }
  0x22   :  { %1727 = vmatmul.mubr.bf16.vlgmr.msra.gmra.mrb[0].mxu0 %v2221_v32  ;;  %2509 = vmatprep.subr.bf16.mxu1 %v2764_v40  ;;  %v2818_v32 = vld [vmem:[%s3602_s1 + $0x268] sm:$0xff]   ;;  %v2826_v40 = vld [vmem:[%s3602_s1 + $0x278] sm:$0xff]  }
  0x23   :  { %2488 = vmatpush3.bf16.msra.mxu0 %v2763_v39  ;;  %1806 = vmatprep.mubr.bf16.mxu0 %v2226_v7  ;;  %v2825_v39 = vld [vmem:[%s3602_s1 + $0x2b0] sm:$0xff]   ;;  %v2855_v7 = vld [vmem:[%s3602_s1 + $0x328] sm:$0xff]  }
  0x24   :  { %1767 = vmatmul.mubr.bf16.vlgmr.msra.gmra.mrb[0].mxu1 %v2223_v37  ;;  %2489 = vmatprep.subr.bf16.mxu0 %v2766_v42  ;;  %v2823_v37 = vld [vmem:[%s3602_s1 + $0x230] sm:$0xff]   ;;  %v2828_v42 = vld [vmem:[%s3602_s1 + $0x2f8] sm:$0xff]  }
  0x25   :  { %2510 = vmatpush3.bf16.msra.mxu1 %v2765_v41  ;;  %1846 = vmatprep.mubr.bf16.mxu1 %v2228_v12  ;;  %v2827_v41 = vld [vmem:[%s3602_s1 + $0x238] sm:$0xff]   ;;  %v2860_v12 = vld [vmem:[%s3602_s1 + $0x3f0] sm:$0xff]  }
  0x26   :  { %2511 = vmatprep.subr.bf16.mxu1 %v2768_v44 }
  0x27   :  { %2490 = vmatpush3.bf16.msra.mxu0 %v2767_v43  ;;  %v19_v43 = vld [vmem:[%s3603_s0 + $0x20] sm:$0xff] }
  0x28   :  { %2491 = vmatprep.subr.bf16.mxu0 %v2770_v46  ;;  %v2229_v44 = vcombine.low %v19_v43, %v19_v43  ;;  %v2831_v46 = vld [vmem:[%s3602_s1 + $0x2b8] sm:$0xff]  }
  0x29   :  { %2512 = vmatpush3.bf16.msra.mxu1 %v2769_v45  ;;  %v2230_v45 = vcombine.high %v19_v43, %v19_v43  ;;  %v2889_v43 = vld [vmem:[%s3602_s1 + $0x4a0] sm:$0xff]  }
  0x2a   :  { %2513 = vmatprep.subr.bf16.mxu1 %v2772_v48  ;;  %v20_v48 = vld [vmem:[%s3603_s0 + $0x28] sm:$0xff] }
  0x2b   :  { %2492 = vmatpush3.bf16.msra.mxu0 %v2771_v47  ;;  %v2832_v47 = vld [vmem:[%s3602_s1 + $0x340] sm:$0xff]  }
  0x2c   :  { %2493 = vmatprep.subr.bf16.mxu0 %v2774_v50  ;;  %v2232_v50 = vcombine.high %v20_v48, %v20_v48 }
  0x2d   :  { %2514 = vmatpush3.bf16.msra.mxu1 %v2773_v49  ;;  %v2231_v49 = vcombine.low %v20_v48, %v20_v48  ;;  %v2894_v48 = vld [vmem:[%s3602_s1 + $0x470] sm:$0xff]  }
  0x2e   :  { %2515 = vmatprep.subr.bf16.mxu1 %v2776_v52  ;;  %v2836_v52 = vld [vmem:[%s3602_s1 + $0x3c0] sm:$0xff]  }
  0x2f   :  { %2494 = vmatpush3.bf16.msra.mxu0 %v2775_v51  ;;  %v2835_v51 = vld [vmem:[%s3602_s1 + $0x300] sm:$0xff]  }
  0x30   :  { %2495 = vmatprep.subr.bf16.mxu0 %v2778_v54  ;;  %v2838_v54 = vld [vmem:[%s3602_s1 + $0x348] sm:$0xff]  }
  0x31   :  { %2516 = vmatpush3.bf16.msra.mxu1 %v2777_v53  ;;  %v2837_v53 = vld [vmem:[%s3602_s1 + $0x380] sm:$0xff]  }
  0x32   :  { %2517 = vmatprep.subr.bf16.mxu1 %v2780_v56  ;;  %v2840_v56 = vld [vmem:[%s3602_s1 + $0x3c8] sm:$0xff]  }
  0x33   :  { %2496 = vmatpush3.bf16.msra.mxu0 %v2779_v55  ;;  %v2839_v55 = vld [vmem:[%s3602_s1 + $0x308] sm:$0xff]  }
  0x34   :  { %2497 = vmatprep.subr.bf16.mxu0 %v2782_v58  ;;  %v2842_v58 = vld [vmem:[%s3602_s1 + $0x350] sm:$0xff]  }
  0x35   :  { %2518 = vmatpush3.bf16.msra.mxu1 %v2781_v57  ;;  %v2841_v57 = vld [vmem:[%s3602_s1 + $0x388] sm:$0xff]  }
  0x36   :  { %2519 = vmatprep.subr.bf16.mxu1 %v2784_v60  ;;  %v2844_v60 = vld [vmem:[%s3602_s1 + $0x3d0] sm:$0xff]  }
  0x37   :  { %2498 = vmatpush3.bf16.msra.mxu0 %v2783_v59  ;;  %v2843_v59 = vld [vmem:[%s3602_s1 + $0x310] sm:$0xff]  }
  0x38   :  { %2499 = vmatprep.subr.bf16.mxu0 %v2786_v62  ;;  %v2846_v62 = vld [vmem:[%s3602_s1 + $0x358] sm:$0xff]  }
  0x39   :  { %2520 = vmatpush3.bf16.msra.mxu1 %v2785_v61  ;;  %v2845_v61 = vld [vmem:[%s3602_s1 + $0x390] sm:$0xff]  }
  0x3a   :  { %2521 = vmatprep.subr.bf16.mxu1 %v2788_v0  ;;  %v2848_v0 = vld [vmem:[%s3602_s1 + $0x3d8] sm:$0xff]  }
  0x3b   :  { %2500 = vmatpush3.bf16.msra.mxu0 %v2787_v63  ;;  %v2847_v63 = vld [vmem:[%s3602_s1 + $0x318] sm:$0xff]  }
  0x3c   :  { %2501 = vmatprep.subr.bf16.mxu0 %v2790_v2  ;;  %v2850_v2 = vld [vmem:[%s3602_s1 + $0x360] sm:$0xff]  }
  0x3d   :  { %2522 = vmatpush3.bf16.msra.mxu1 %v2789_v1  ;;  %v2849_v1 = vld [vmem:[%s3602_s1 + $0x398] sm:$0xff]  }
  0x3e   :  { %2523 = vmatprep.subr.bf16.mxu1 %v2792_v4  ;;  %v2852_v4 = vld [vmem:[%s3602_s1 + $0x3e0] sm:$0xff]  }
  0x3f   :  { %2502 = vmatpush3.bf16.msra.mxu0 %v2791_v3  ;;  %v2851_v3 = vld [vmem:[%s3602_s1 + $0x320] sm:$0xff]  }
  0x40   :  { %2531 = vmatprep.subr.bf16.mxu0 %v2796_v9  ;;  %v2857_v9 = vld [vmem:[%s3602_s1 + $0x3a8] sm:$0xff]  }
  0x41   :  { %2524 = vmatpush3.bf16.msra.mxu1 %v2795_v8  ;;  %v2856_v8 = vld [vmem:[%s3602_s1 + $0x3e8] sm:$0xff]  }
  0x42   :  { %1807 = vmatmul.mubr.bf16.vlgmr.msra.gmra.mrb[4].mxu0 %v2225_v6  ;;  %2553 = vmatprep.subr.bf16.mxu1 %v2800_v14  ;;  %v2854_v6 = vld [vmem:[%s3602_s1 + $0x368] sm:$0xff]   ;;  %v2862_v14 = vld [vmem:[%s3602_s1 + $0x378] sm:$0xff]  }
  0x43   :  { %2532 = vmatpush3.bf16.msra.mxu0 %v2799_v13  ;;  %1886 = vmatprep.mubr.bf16.mxu0 %v2230_v45  ;;  %v2861_v13 = vld [vmem:[%s3602_s1 + $0x3b0] sm:$0xff]   ;;  %v2891_v45 = vld [vmem:[%s3602_s1 + $0x428] sm:$0xff]  }
  0x44   :  { %1847 = vmatmul.mubr.bf16.vlgmr.msra.gmra.mrb[4].mxu1 %v2227_v11  ;;  %2533 = vmatprep.subr.bf16.mxu0 %v2802_v16  ;;  %v2859_v11 = vld [vmem:[%s3602_s1 + $0x330] sm:$0xff]   ;;  %v2864_v16 = vld [vmem:[%s3602_s1 + $0x3f8] sm:$0xff]  }
  0x45   :  { %2554 = vmatpush3.bf16.msra.mxu1 %v2801_v15  ;;  %1926 = vmatprep.mubr.bf16.mxu1 %v2232_v50  ;;  %v2863_v15 = vld [vmem:[%s3602_s1 + $0x338] sm:$0xff]   ;;  %v2896_v50 = vld [vmem:[%s3602_s1 + $0x4f0] sm:$0xff]  }
  0x46   :  { %2555 = vmatprep.subr.bf16.mxu1 %v2804_v18 }
  0x47   :  { %2534 = vmatpush3.bf16.msra.mxu0 %v2803_v17  ;;  %v21_v17 = vld [vmem:[%s3603_s0 + $0x30] sm:$0xff] }
  0x48   :  { %2535 = vmatprep.subr.bf16.mxu0 %v2806_v20  ;;  %v2233_v18 = vcombine.low %v21_v17, %v21_v17  ;;  %v2867_v20 = vld [vmem:[%s3602_s1 + $0x3b8] sm:$0xff]  }
  0x49   :  { %2556 = vmatpush3.bf16.msra.mxu1 %v2805_v19  ;;  %v2234_v19 = vcombine.high %v21_v17, %v21_v17  ;;  %v2925_v17 = vld [vmem:[%s3602_s1 + $0x5a0] sm:$0xff]  }
  0x4a   :  { %2557 = vmatprep.subr.bf16.mxu1 %v2808_v22  ;;  %v22_v22 = vld [vmem:[%s3603_s0 + $0x38] sm:$0xff] }
  0x4b   :  { %2536 = vmatpush3.bf16.msra.mxu0 %v2807_v21  ;;  %v2868_v21 = vld [vmem:[%s3602_s1 + $0x440] sm:$0xff]  }
  0x4c   :  { %2537 = vmatprep.subr.bf16.mxu0 %v2810_v24  ;;  %v2236_v24 = vcombine.high %v22_v22, %v22_v22 }
  0x4d   :  { %2558 = vmatpush3.bf16.msra.mxu1 %v2809_v23  ;;  %v2235_v23 = vcombine.low %v22_v22, %v22_v22  ;;  %v2930_v22 = vld [vmem:[%s3602_s1 + $0x570] sm:$0xff]  }
  0x4e   :  { %2559 = vmatprep.subr.bf16.mxu1 %v2812_v26  ;;  %v2872_v26 = vld [vmem:[%s3602_s1 + $0x4c0] sm:$0xff]  }
  0x4f   :  { %2538 = vmatpush3.bf16.msra.mxu0 %v2811_v25  ;;  %v2871_v25 = vld [vmem:[%s3602_s1 + $0x400] sm:$0xff]  }
  0x50   :  { %2539 = vmatprep.subr.bf16.mxu0 %v2814_v28  ;;  %v2874_v28 = vld [vmem:[%s3602_s1 + $0x448] sm:$0xff]  }
  0x51   :  { %2560 = vmatpush3.bf16.msra.mxu1 %v2813_v27  ;;  %v2873_v27 = vld [vmem:[%s3602_s1 + $0x480] sm:$0xff]  }
  0x52   :  { %2561 = vmatprep.subr.bf16.mxu1 %v2816_v30  ;;  %v2876_v30 = vld [vmem:[%s3602_s1 + $0x4c8] sm:$0xff]  }
  0x53   :  { %2540 = vmatpush3.bf16.msra.mxu0 %v2815_v29  ;;  %v2875_v29 = vld [vmem:[%s3602_s1 + $0x408] sm:$0xff]  }
  0x54   :  { %2541 = vmatprep.subr.bf16.mxu0 %v2818_v32  ;;  %v2878_v32 = vld [vmem:[%s3602_s1 + $0x450] sm:$0xff]  }
  0x55   :  { %2562 = vmatpush3.bf16.msra.mxu1 %v2817_v31  ;;  %v2877_v31 = vld [vmem:[%s3602_s1 + $0x488] sm:$0xff]  }
  0x56   :  { %2563 = vmatprep.subr.bf16.mxu1 %v2820_v34  ;;  %v2880_v34 = vld [vmem:[%s3602_s1 + $0x4d0] sm:$0xff]  }
  0x57   :  { %2542 = vmatpush3.bf16.msra.mxu0 %v2819_v33  ;;  %v2879_v33 = vld [vmem:[%s3602_s1 + $0x410] sm:$0xff]  }
  0x58   :  { %2543 = vmatprep.subr.bf16.mxu0 %v2822_v36  ;;  %v2882_v36 = vld [vmem:[%s3602_s1 + $0x458] sm:$0xff]  }
  0x59   :  { %2564 = vmatpush3.bf16.msra.mxu1 %v2821_v35  ;;  %v2881_v35 = vld [vmem:[%s3602_s1 + $0x490] sm:$0xff]  }
  0x5a   :  { %2565 = vmatprep.subr.bf16.mxu1 %v2824_v38  ;;  %v2884_v38 = vld [vmem:[%s3602_s1 + $0x4d8] sm:$0xff]  }
  0x5b   :  { %2544 = vmatpush3.bf16.msra.mxu0 %v2823_v37  ;;  %v2883_v37 = vld [vmem:[%s3602_s1 + $0x418] sm:$0xff]  }
  0x5c   :  { %2545 = vmatprep.subr.bf16.mxu0 %v2826_v40  ;;  %v2886_v40 = vld [vmem:[%s3602_s1 + $0x460] sm:$0xff]  }
  0x5d   :  { %2566 = vmatpush3.bf16.msra.mxu1 %v2825_v39  ;;  %v2885_v39 = vld [vmem:[%s3602_s1 + $0x498] sm:$0xff]  }
  0x5e   :  { %2567 = vmatprep.subr.bf16.mxu1 %v2828_v42  ;;  %v2888_v42 = vld [vmem:[%s3602_s1 + $0x4e0] sm:$0xff]  }
  0x5f   :  { %2546 = vmatpush3.bf16.msra.mxu0 %v2827_v41  ;;  %v2887_v41 = vld [vmem:[%s3602_s1 + $0x420] sm:$0xff]  }
  0x60   :  { %2575 = vmatprep.subr.bf16.mxu0 %v2832_v47  ;;  %v2893_v47 = vld [vmem:[%s3602_s1 + $0x4a8] sm:$0xff]  }
  0x61   :  { %2568 = vmatpush3.bf16.msra.mxu1 %v2831_v46  ;;  %v2892_v46 = vld [vmem:[%s3602_s1 + $0x4e8] sm:$0xff]  }
  0x62   :  { %1887 = vmatmul.mubr.bf16.vlgmr.msra.gmra.mrb[8].mxu0 %v2229_v44  ;;  %2597 = vmatprep.subr.bf16.mxu1 %v2836_v52  ;;  %v2890_v44 = vld [vmem:[%s3602_s1 + $0x468] sm:$0xff]   ;;  %v2898_v52 = vld [vmem:[%s3602_s1 + $0x478] sm:$0xff]  }
  0x63   :  { %2576 = vmatpush3.bf16.msra.mxu0 %v2835_v51  ;;  %1966 = vmatprep.mubr.bf16.mxu0 %v2234_v19  ;;  %v2897_v51 = vld [vmem:[%s3602_s1 + $0x4b0] sm:$0xff]   ;;  %v2927_v19 = vld [vmem:[%s3602_s1 + $0x528] sm:$0xff]  }
  0x64   :  { %1927 = vmatmul.mubr.bf16.vlgmr.msra.gmra.mrb[8].mxu1 %v2231_v49  ;;  %2577 = vmatprep.subr.bf16.mxu0 %v2838_v54  ;;  %v2895_v49 = vld [vmem:[%s3602_s1 + $0x430] sm:$0xff]   ;;  %v2900_v54 = vld [vmem:[%s3602_s1 + $0x4f8] sm:$0xff]  }
  0x65   :  { %2598 = vmatpush3.bf16.msra.mxu1 %v2837_v53  ;;  %2006 = vmatprep.mubr.bf16.mxu1 %v2236_v24  ;;  %v2899_v53 = vld [vmem:[%s3602_s1 + $0x438] sm:$0xff]   ;;  %v2932_v24 = vld [vmem:[%s3602_s1 + $0x5f0] sm:$0xff]  }
  0x66   :  { %2599 = vmatprep.subr.bf16.mxu1 %v2840_v56 }
  0x67   :  { %2578 = vmatpush3.bf16.msra.mxu0 %v2839_v55  ;;  %v23_v55 = vld [vmem:[%s3603_s0 + $0x40] sm:$0xff] }
  0x68   :  { %2579 = vmatprep.subr.bf16.mxu0 %v2842_v58  ;;  %v2237_v56 = vcombine.low %v23_v55, %v23_v55  ;;  %v2903_v58 = vld [vmem:[%s3602_s1 + $0x4b8] sm:$0xff]  }
  0x69   :  { %2600 = vmatpush3.bf16.msra.mxu1 %v2841_v57  ;;  %v2238_v57 = vcombine.high %v23_v55, %v23_v55 }
  0x6a   :  { %2601 = vmatprep.subr.bf16.mxu1 %v2844_v60  ;;  %v24_v60 = vld [vmem:[%s3603_s0 + $0x48] sm:$0xff] }
  0x6b   :  { %2580 = vmatpush3.bf16.msra.mxu0 %v2843_v59  ;;  %v2904_v59 = vld [vmem:[%s3602_s1 + $0x540] sm:$0xff]  }
  0x6c   :  { %2581 = vmatprep.subr.bf16.mxu0 %v2846_v62  ;;  %v2240_v62 = vcombine.high %v24_v60, %v24_v60 }
  0x6d   :  { %2602 = vmatpush3.bf16.msra.mxu1 %v2845_v61  ;;  %v2239_v61 = vcombine.low %v24_v60, %v24_v60 }
  0x6e   :  { %2603 = vmatprep.subr.bf16.mxu1 %v2848_v0  ;;  %v2908_v0 = vld [vmem:[%s3602_s1 + $0x5c0] sm:$0xff]  }
  0x6f   :  { %2582 = vmatpush3.bf16.msra.mxu0 %v2847_v63  ;;  %v2907_v63 = vld [vmem:[%s3602_s1 + $0x500] sm:$0xff]  }
  0x70   :  { %2583 = vmatprep.subr.bf16.mxu0 %v2850_v2  ;;  %v2910_v2 = vld [vmem:[%s3602_s1 + $0x548] sm:$0xff]  }
  0x71   :  { %2604 = vmatpush3.bf16.msra.mxu1 %v2849_v1  ;;  %v2909_v1 = vld [vmem:[%s3602_s1 + $0x580] sm:$0xff]  }
  0x72   :  { %2605 = vmatprep.subr.bf16.mxu1 %v2852_v4  ;;  %v2912_v4 = vld [vmem:[%s3602_s1 + $0x5c8] sm:$0xff]  }
  0x73   :  { %2584 = vmatpush3.bf16.msra.mxu0 %v2851_v3  ;;  %v2911_v3 = vld [vmem:[%s3602_s1 + $0x508] sm:$0xff]  }
  0x74   :  { %2585 = vmatprep.subr.bf16.mxu0 %v2854_v6  ;;  %v2914_v6 = vld [vmem:[%s3602_s1 + $0x550] sm:$0xff]  }
  0x75   :  { %2606 = vmatpush3.bf16.msra.mxu1 %v2853_v5  ;;  %v2913_v5 = vld [vmem:[%s3602_s1 + $0x588] sm:$0xff]  }
  0x76   :  { %2607 = vmatprep.subr.bf16.mxu1 %v2856_v8  ;;  %v2916_v8 = vld [vmem:[%s3602_s1 + $0x5d0] sm:$0xff]  }
  0x77   :  { %2586 = vmatpush3.bf16.msra.mxu0 %v2855_v7  ;;  %v2915_v7 = vld [vmem:[%s3602_s1 + $0x510] sm:$0xff]  }
  0x78   :  { %2587 = vmatprep.subr.bf16.mxu0 %v2858_v10  ;;  %v2918_v10 = vld [vmem:[%s3602_s1 + $0x558] sm:$0xff]  }
  0x79   :  { %2608 = vmatpush3.bf16.msra.mxu1 %v2857_v9  ;;  %v2917_v9 = vld [vmem:[%s3602_s1 + $0x590] sm:$0xff]  }
  0x7a   :  { %2609 = vmatprep.subr.bf16.mxu1 %v2860_v12  ;;  %v2920_v12 = vld [vmem:[%s3602_s1 + $0x5d8] sm:$0xff]  }
  0x7b   :  { %2588 = vmatpush3.bf16.msra.mxu0 %v2859_v11  ;;  %v2919_v11 = vld [vmem:[%s3602_s1 + $0x518] sm:$0xff]  }
  0x7c   :  { %2589 = vmatprep.subr.bf16.mxu0 %v2862_v14  ;;  %v2922_v14 = vld [vmem:[%s3602_s1 + $0x560] sm:$0xff]  }
  0x7d   :  { %2610 = vmatpush3.bf16.msra.mxu1 %v2861_v13  ;;  %v2921_v13 = vld [vmem:[%s3602_s1 + $0x598] sm:$0xff]  }
  0x7e   :  { %2611 = vmatprep.subr.bf16.mxu1 %v2864_v16  ;;  %v2924_v16 = vld [vmem:[%s3602_s1 + $0x5e0] sm:$0xff]  }
  0x7f   :  { %2590 = vmatpush3.bf16.msra.mxu0 %v2863_v15  ;;  %v2923_v15 = vld [vmem:[%s3602_s1 + $0x520] sm:$0xff]  }
  0x80   :  { %2619 = vmatprep.subr.bf16.mxu0 %v2868_v21  ;;  %v2929_v21 = vld [vmem:[%s3602_s1 + $0x5a8] sm:$0xff]  }
  0x81   :  { %2612 = vmatpush3.bf16.msra.mxu1 %v2867_v20  ;;  %v2928_v20 = vld [vmem:[%s3602_s1 + $0x5e8] sm:$0xff]  }
  0x82   :  { %1967 = vmatmul.mubr.bf16.vlgmr.msra.gmra.mrb[12].mxu0 %v2233_v18  ;;  %2641 = vmatprep.subr.bf16.mxu1 %v2872_v26  ;;  %v2926_v18 = vld [vmem:[%s3602_s1 + $0x568] sm:$0xff]   ;;  %v2934_v26 = vld [vmem:[%s3602_s1 + $0x578] sm:$0xff]  }
  0x83   :  { %2620 = vmatpush3.bf16.msra.mxu0 %v2871_v25  ;;  %2046 = vmatprep.mubr.bf16.mxu0 %v2238_v57  ;;  %v2933_v25 = vld [vmem:[%s3602_s1 + $0x5b0] sm:$0xff]  }
  0x84   :  { %2007 = vmatmul.mubr.bf16.vlgmr.msra.gmra.mrb[12].mxu1 %v2235_v23  ;;  %2621 = vmatprep.subr.bf16.mxu0 %v2874_v28  ;;  %v2931_v23 = vld [vmem:[%s3602_s1 + $0x530] sm:$0xff]   ;;  %v2936_v28 = vld [vmem:[%s3602_s1 + $0x5f8] sm:$0xff]  }
  0x85   :  { %2642 = vmatpush3.bf16.msra.mxu1 %v2873_v27  ;;  %2086 = vmatprep.mubr.bf16.mxu1 %v2240_v62  ;;  %v2935_v27 = vld [vmem:[%s3602_s1 + $0x538] sm:$0xff]  }
  0x86   :  { %2643 = vmatprep.subr.bf16.mxu1 %v2876_v30 }
  0x87   :  { %2622 = vmatpush3.bf16.msra.mxu0 %v2875_v29  ;;  %v25_v29 = vld [vmem:[%s3603_s0 + $0x50] sm:$0xff] }
  0x88   :  { %2623 = vmatprep.subr.bf16.mxu0 %v2878_v32  ;;  %v2241_v30 = vcombine.low %v25_v29, %v25_v29  ;;  %v2939_v32 = vld [vmem:[%s3602_s1 + $0x5b8] sm:$0xff]  }
  0x89   :  { %2644 = vmatpush3.bf16.msra.mxu1 %v2877_v31  ;;  %v2242_v31 = vcombine.high %v25_v29, %v25_v29 }
  0x8a   :  { %2645 = vmatprep.subr.bf16.mxu1 %v2880_v34  ;;  %v2947_v34 = vmov 0.0  }
  0x8b   :  { %2624 = vmatpush3.bf16.msra.mxu0 %v2879_v33  ;;  %v26_v33 = vld [vmem:[%s3603_s0 + $0x58] sm:$0xff] }
  0x8c   :  { %2625 = vmatprep.subr.bf16.mxu0 %v2882_v36  ;;  %v2244_v36 = vcombine.high %v26_v33, %v26_v33 }
  0x8d   :  { %2646 = vmatpush3.bf16.msra.mxu1 %v2881_v35  ;;  %v2243_v35 = vcombine.low %v26_v33, %v26_v33 }
  0x8e   :  { %2647 = vmatprep.subr.bf16.mxu1 %v2884_v38  ;;  %v2943_v38 = vld [vmem:[%s3602_s1 + $0x608] sm:$0xff]  }
  0x8f   :  { %2626 = vmatpush3.bf16.msra.mxu0 %v2883_v37  ;;  %v2942_v37 = vld [vmem:[%s3602_s1 + $0x600] sm:$0xff]  }
  0x90   :  { %2627 = vmatprep.subr.bf16.mxu0 %v2886_v40  ;;  %v2945_v40 = vld [vmem:[%s3602_s1 + $0x618] sm:$0xff]  }
  0x91   :  { %2648 = vmatpush3.bf16.msra.mxu1 %v2885_v39  ;;  %v2944_v39 = vld [vmem:[%s3602_s1 + $0x610] sm:$0xff]  }
  0x92   :  { %2649 = vmatprep.subr.bf16.mxu1 %v2888_v42 }
  0x93   :  { %2628 = vmatpush3.bf16.msra.mxu0 %v2887_v41  ;;  %v2946_v41 = vld [vmem:[%s3603_s0 + $0x60] ss:$0 sps:$4 sm:$0xff]  }
  0x94   :  { %2629 = vmatprep.subr.bf16.mxu0 %v2890_v44 }
  0x95   :  { %2650 = vmatpush3.bf16.msra.mxu1 %v2889_v43  ;;  %v2220_v43 = vld [vmem:[%s3604_s2] ss:$0 sm:$0xff] }
  0x96   :  { %2651 = vmatprep.subr.bf16.mxu1 %v2892_v46 }
  0x97   :  { %2630 = vmatpush3.bf16.msra.mxu0 %v2891_v45 }
  0x98   :  { %2631 = vmatprep.subr.bf16.mxu0 %v2894_v48 }
  0x99   :  { %2652 = vmatpush3.bf16.msra.mxu1 %v2893_v47 }
  0x9a   :  { %2653 = vmatprep.subr.bf16.mxu1 %v2896_v50 }
  0x9b   :  { %2632 = vmatpush3.bf16.msra.mxu0 %v2895_v49 }
  0x9c   :  { %2633 = vmatprep.subr.bf16.mxu0 %v2898_v52 }
  0x9d   :  { %2654 = vmatpush3.bf16.msra.mxu1 %v2897_v51 }
  0x9e   :  { %2655 = vmatprep.subr.bf16.mxu1 %v2900_v54 }
  0x9f   :  { %2634 = vmatpush3.bf16.msra.mxu0 %v2899_v53 }
  0xa0   :  { %2663 = vmatprep.subr.bf16.mxu0 %v2904_v59 }
  0xa1   :  { %2656 = vmatpush3.bf16.msra.mxu1 %v2903_v58 }
  0xa2   :  { %2047 = vmatmul.mubr.bf16.vlgmr.msra.gmra.mrb[16].mxu0 %v2237_v56  ;;  %2685 = vmatprep.subr.bf16.mxu1 %v2908_v0 }
  0xa3   :  { %2664 = vmatpush3.bf16.msra.mxu0 %v2907_v63  ;;  %2126 = vmatprep.mubr.bf16.mxu0 %v2242_v31 }
  0xa4   :  { %2087 = vmatmul.mubr.bf16.vlgmr.msra.gmra.mrb[16].mxu1 %v2239_v61  ;;  %2665 = vmatprep.subr.bf16.mxu0 %v2910_v2 }
  0xa5   :  { %2686 = vmatpush3.bf16.msra.mxu1 %v2909_v1  ;;  %2166 = vmatprep.mubr.bf16.mxu1 %v2244_v36 }
  0xa6   :  { %2687 = vmatprep.subr.bf16.mxu1 %v2912_v4 }
  0xa7   :  { %2666 = vmatpush3.bf16.msra.mxu0 %v2911_v3 }
  0xa8   :  { %2667 = vmatprep.subr.bf16.mxu0 %v2914_v6 }
  0xa9   :  { %2688 = vmatpush3.bf16.msra.mxu1 %v2913_v5 }
  0xaa   :  { %2689 = vmatprep.subr.bf16.mxu1 %v2916_v8 }
  0xab   :  { %2668 = vmatpush3.bf16.msra.mxu0 %v2915_v7 }
  0xac   :  { %2669 = vmatprep.subr.bf16.mxu0 %v2918_v10 }
  0xad   :  { %2690 = vmatpush3.bf16.msra.mxu1 %v2917_v9 }
  0xae   :  { %2691 = vmatprep.subr.bf16.mxu1 %v2920_v12 }
  0xaf   :  { %2670 = vmatpush3.bf16.msra.mxu0 %v2919_v11 }
  0xb0   :  { %2671 = vmatprep.subr.bf16.mxu0 %v2922_v14 }
  0xb1   :  { %2692 = vmatpush3.bf16.msra.mxu1 %v2921_v13 }
  0xb2   :  { %2693 = vmatprep.subr.bf16.mxu1 %v2924_v16 }
  0xb3   :  { %2672 = vmatpush3.bf16.msra.mxu0 %v2923_v15 }
  0xb4   :  { %2673 = vmatprep.subr.bf16.mxu0 %v2926_v18 }
  0xb5   :  { %2694 = vmatpush3.bf16.msra.mxu1 %v2925_v17 }
  0xb6   :  { %2695 = vmatprep.subr.bf16.mxu1 %v2928_v20 }
  0xb7   :  { %2674 = vmatpush3.bf16.msra.mxu0 %v2927_v19 }
  0xb8   :  { %2675 = vmatprep.subr.bf16.mxu0 %v2930_v22 }
  0xb9   :  { %2696 = vmatpush3.bf16.msra.mxu1 %v2929_v21 }
  0xba   :  { %2697 = vmatprep.subr.bf16.mxu1 %v2932_v24 }
  0xbb   :  { %2676 = vmatpush3.bf16.msra.mxu0 %v2931_v23 }
  0xbc   :  { %2677 = vmatprep.subr.bf16.mxu0 %v2934_v26 }
  0xbd   :  { %2698 = vmatpush3.bf16.msra.mxu1 %v2933_v25 }
  0xbe   :  { %2699 = vmatprep.subr.bf16.mxu1 %v2936_v28 }
  0xbf   :  { %2678 = vmatpush3.bf16.msra.mxu0 %v2935_v27 }
  0xc0   :  { %2712 = vmatprep.subr.bf16.mxu0 %v2947_v34 }
  0xc1   :  { %2700 = vmatpush3.bf16.msra.mxu1 %v2939_v32 }
  0xc2   :  { %2127 = vmatmul.mubr.bf16.vlgmr.msra.gmra.mrb[20].mxu0 %v2241_v30 }
  0xc3   :  { %2713 = vmatpush3.bf16.msra.mxu0 %v2942_v37  ;;  %2720 = vmatprep.mubr.msk.bf16.mxu0 %vm2948_vm0, %v2947_v34 }
  0xc4   :  { %2167 = vmatmul.mubr.bf16.vlgmr.msra.gmra.mrb[20].mxu1 %v2243_v35  ;;  %2714 = vmatprep.subr.bf16.mxu0 %v2947_v34 }
  0xc7   :  { %2715 = vmatpush3.bf16.msra.mxu0 %v2943_v38 }
  0xc8   :  { %2716 = vmatprep.subr.bf16.mxu0 %v2947_v34 }
  0xcb   :  { %2717 = vmatpush3.bf16.msra.mxu0 %v2944_v39 }
  0xcc   :  { %2718 = vmatprep.subr.bf16.mxu0 %v2947_v34 }
  0xcf   :  { %2719 = vmatpush3.bf16.msra.mxu0 %v2945_v40 }
  0xd2   :  { %2721 = vmatmul.mubr.msk.bf16.vlgmr.msra.gmra.mrb[24].mxu0 %vm1690_vm1, %v2946_v41 }
  0xf5   :  { %v2459_v42 = vpop.f32.mrb[0].mxu0 }
  0xf6   :  { %v2460_v44 = vpop.f32.mrb[1].mxu0 }
  0xf7   :  { %v2461_v45 = vadd.f32 %v2460_v44, %v2459_v42  ;;  %v2462_v46 = vpop.f32.mrb[2].mxu0  ;;  %v2481_v47 = vpop.f32.mrb[0].mxu1 }
  0xf8   :  { %v2463_v48 = vpop.f32.mrb[3].mxu0  ;;  %v2482_v49 = vpop.f32.mrb[1].mxu1 }
  0xf9   :  { %v1729_v50 = vadd.f32 %v2461_v45, %v2220_v43  ;;  %v2483_v51 = vadd.f32 %v2482_v49, %v2481_v47  ;;  %v2484_v52 = vpop.f32.mrb[2].mxu1 }
  0xfa   :  { %v2485_v53 = vpop.f32.mrb[3].mxu1 }
  0xfb   :  { %v1769_v54 = vadd.f32 %v2483_v51, %v1729_v50 }
 0x115   :  { %v2503_v55 = vpop.f32.mrb[4].mxu0 }
 0x116   :  { %v2504_v56 = vpop.f32.mrb[5].mxu0 }
 0x117   :  { %v2505_v57 = vadd.f32 %v2504_v56, %v2503_v55  ;;  %v2506_v58 = vpop.f32.mrb[6].mxu0  ;;  %v2525_v59 = vpop.f32.mrb[4].mxu1 }
 0x118   :  { %v2507_v60 = vpop.f32.mrb[7].mxu0  ;;  %v2526_v62 = vpop.f32.mrb[5].mxu1 }
 0x119   :  { %v1809_v61 = vadd.f32 %v2505_v57, %v1769_v54  ;;  %v2527_v63 = vadd.f32 %v2526_v62, %v2525_v59  ;;  %v2528_v0 = vpop.f32.mrb[6].mxu1 }
 0x11a   :  { %v2529_v1 = vpop.f32.mrb[7].mxu1 }
 0x11b   :  { %v1849_v2 = vadd.f32 %v2527_v63, %v1809_v61 }
 0x135   :  { %v2547_v3 = vpop.f32.mrb[8].mxu0 }
 0x136   :  { %v2548_v4 = vpop.f32.mrb[9].mxu0 }
 0x137   :  { %v2549_v5 = vadd.f32 %v2548_v4, %v2547_v3  ;;  %v2550_v6 = vpop.f32.mrb[10].mxu0  ;;  %v2569_v7 = vpop.f32.mrb[8].mxu1 }
 0x138   :  { %v2551_v8 = vpop.f32.mrb[11].mxu0  ;;  %v2570_v9 = vpop.f32.mrb[9].mxu1 }
 0x139   :  { %v1889_v10 = vadd.f32 %v2549_v5, %v1849_v2  ;;  %v2571_v11 = vadd.f32 %v2570_v9, %v2569_v7  ;;  %v2572_v12 = vpop.f32.mrb[10].mxu1 }
 0x13a   :  { %v2573_v13 = vpop.f32.mrb[11].mxu1 }
 0x13b   :  { %v1929_v14 = vadd.f32 %v2571_v11, %v1889_v10 }
 0x155   :  { %v2591_v15 = vpop.f32.mrb[12].mxu0 }
 0x156   :  { %v2592_v16 = vpop.f32.mrb[13].mxu0 }
 0x157   :  { %v2593_v17 = vadd.f32 %v2592_v16, %v2591_v15  ;;  %v2594_v18 = vpop.f32.mrb[14].mxu0  ;;  %v2613_v19 = vpop.f32.mrb[12].mxu1 }
 0x158   :  { %v2595_v20 = vpop.f32.mrb[15].mxu0  ;;  %v2614_v21 = vpop.f32.mrb[13].mxu1 }
 0x159   :  { %v1969_v22 = vadd.f32 %v2593_v17, %v1929_v14  ;;  %v2615_v23 = vadd.f32 %v2614_v21, %v2613_v19  ;;  %v2616_v24 = vpop.f32.mrb[14].mxu1 }
 0x15a   :  { %v2617_v25 = vpop.f32.mrb[15].mxu1 }
 0x15b   :  { %v2009_v26 = vadd.f32 %v2615_v23, %v1969_v22 }
 0x175   :  { %v2635_v27 = vpop.f32.mrb[16].mxu0 }
 0x176   :  { %v2636_v28 = vpop.f32.mrb[17].mxu0 }
 0x177   :  { %v2637_v29 = vadd.f32 %v2636_v28, %v2635_v27  ;;  %v2638_v30 = vpop.f32.mrb[18].mxu0  ;;  %v2657_v31 = vpop.f32.mrb[16].mxu1 }
 0x178   :  { %v2639_v32 = vpop.f32.mrb[19].mxu0  ;;  %v2658_v34 = vpop.f32.mrb[17].mxu1 }
 0x179   :  { %v2049_v33 = vadd.f32 %v2637_v29, %v2009_v26  ;;  %v2659_v35 = vadd.f32 %v2658_v34, %v2657_v31  ;;  %v2660_v36 = vpop.f32.mrb[18].mxu1 }
 0x17a   :  { %v2661_v37 = vpop.f32.mrb[19].mxu1 }
 0x17b   :  { %v2089_v38 = vadd.f32 %v2659_v35, %v2049_v33 }
 0x195   :  { %v2679_v39 = vpop.f32.mrb[20].mxu0 }
 0x196   :  { %v2680_v40 = vpop.f32.mrb[21].mxu0 }
 0x197   :  { %v2681_v41 = vadd.f32 %v2680_v40, %v2679_v39  ;;  %v2682_v42 = vpop.f32.mrb[22].mxu0  ;;  %v2701_v43 = vpop.f32.mrb[20].mxu1 }
 0x198   :  { %v2683_v44 = vpop.f32.mrb[23].mxu0  ;;  %v2702_v45 = vpop.f32.mrb[21].mxu1 }
 0x199   :  { %v2129_v46 = vadd.f32 %v2681_v41, %v2089_v38  ;;  %v2703_v47 = vadd.f32 %v2702_v45, %v2701_v43  ;;  %v2704_v48 = vpop.f32.mrb[22].mxu1 }
 0x19a   :  { %v2705_v49 = vpop.f32.mrb[23].mxu1 }
 0x19b   :  { %v2169_v50 = vadd.f32 %v2703_v47, %v2129_v46 }
 0x1a5   :  { %v2208_v51 = vpop.f32.mrb[24].mxu0 }
 0x1a6   :  { %v2209_v52 = vadd.f32 %v2208_v51, %v2169_v50  ;;  %v2722_v53 = vpop.f32.mrb[25].mxu0 }
 0x1a7   :  { %v2211_v54 = vpop.f32.mrb[26].mxu0 }
 0x1a8   :  { %2215 = vst.msk [vmem:[%s3605_s3] sm:$0xff] %vm2214_vm2, %v2209_v52  ;;  %v2723_v55 = vpop.f32.mrb[27].mxu0 }

</bundles_post_ra>
